<compile_context>
chip_gen: v5e
topology: v5e:2x2
jax: 0.10.0
libtpu: 0.0.40
codegen_flags: <defaults>
</compile_context>

<pallas_src>
import functools
import math

import jax
import jax.numpy as jnp
from jax import lax
from jax.experimental import pallas as pl
from jax.experimental.pallas import tpu as pltpu

# ---- model hyperparameters (small, consistent with the module) ----
BATCH = 2
SEQ = 8
INPUT_DIM = 32
EMBED_DIM = 32
NUM_HEADS = 4
HEAD_DIM = EMBED_DIM // NUM_HEADS

_HIGHEST = lax.Precision.HIGHEST


def mha_kernel(x_ref, wqkv_ref, bqkv_ref, wo_ref, bo_ref, o_ref, *, batch, seq):
    """Whole forward in one grid step.

    x_ref    : (B*S, D)   VMEM (batch folded into rows)
    wqkv_ref : (D, 3*E)   VMEM (columns grouped [Q|K|V], head-major inside, Q pre-scaled)
    bqkv_ref : (1, 3*E)   VMEM (same grouping / scaling)
    wo_ref   : (E, E)     VMEM (transposed nn.Linear weight)
    bo_ref   : (1, E)     VMEM
    o_ref    : (B*S, E)   VMEM
    """
    E, H, HD = EMBED_DIM, NUM_HEADS, HEAD_DIM
    bs = batch * seq

    x = x_ref[...]                                                     # (B*S, D)

    # Fused QKV projection: one (B*S, D) @ (D, 3E) MXU matmul.
    # 1/sqrt(head_dim) is already folded into the Q columns of the weight/bias.
    qkv = jnp.dot(x, wqkv_ref[...], preferred_element_type=jnp.float32,
                  precision=_HIGHEST) + bqkv_ref[...]                  # (B*S, 3E)

    # Per-head attention with batch as a dot_general batch dim: only the (B, S, S)
    # in-batch logits blocks are computed (no all-pairs buffer, no mask), and the
    # head "un-stack" is folded into the O-projection accumulation.
    o = jnp.broadcast_to(bo_ref[...], (bs, E)).astype(jnp.float32)     # hoisted, once
    for h in range(H):
        q = qkv[:, 0 * E + h * HD:0 * E + (h + 1) * HD].reshape(batch, seq, HD)
        k = qkv[:, 1 * E + h * HD:1 * E + (h + 1) * HD].reshape(batch, seq, HD)
        v = qkv[:, 2 * E + h * HD:2 * E + (h + 1) * HD].reshape(batch, seq, HD)

        logits = jnp.einsum("bqd,bkd->bqk", q, k,
                            preferred_element_type=jnp.float32,
                            precision=_HIGHEST)                        # (B, S, S)
        logits = logits - jnp.max(logits, axis=-1, keepdims=True)
        p = jnp.exp(logits)
        attn = p / jnp.sum(p, axis=-1, keepdims=True)                  # exact softmax

        vals = jnp.einsum("bqk,bkd->bqd", attn, v,
                          preferred_element_type=jnp.float32,
                          precision=_HIGHEST)                          # (B, S, hd)

        # O-projection contribution of this head: (B*S, hd) @ (hd, E).
        o = o + jnp.dot(vals.reshape(bs, HD), wo_ref[h * HD:(h + 1) * HD, :],
                        preferred_element_type=jnp.float32, precision=_HIGHEST)

    o_ref[...] = o.astype(o_ref.dtype)


def prepare_params(w_qkv, b_qkv, w_o, b_o):
    """One-time weight preparation (hoisted out of the per-call hot path).

    * Regroups QKV columns from the PyTorch per-head interleaving
      [q0 k0 v0 | q1 k1 v1 | ...] to [Q_allheads | K_allheads | V_allheads]
      so in-kernel per-head slices are contiguous lane blocks.
    * Folds 1/sqrt(head_dim) into the Q columns of the weight and bias.
    * Transposes to (in_features, out_features) layout for `x @ W`.
    """
    E, H, HD = EMBED_DIM, NUM_HEADS, HEAD_DIM
    D = w_qkv.shape[1]
    wqkv_t = jnp.transpose(w_qkv.T.reshape(D, H, 3, HD), (0, 2, 1, 3)).reshape(D, 3 * E)
    bqkv_r = jnp.transpose(b_qkv.reshape(H, 3, HD), (1, 0, 2)).reshape(1, 3 * E)

    scale = 1.0 / math.sqrt(HD)
    col_scale = jnp.concatenate([
        jnp.full((E,), scale, dtype=wqkv_t.dtype),
        jnp.ones((2 * E,), dtype=wqkv_t.dtype)])
    wqkv_t = wqkv_t * col_scale[None, :]
    bqkv_r = bqkv_r * col_scale[None, :]

    wo_t = w_o.T                                                       # (E, E)
    bo_r = b_o.reshape(1, E)
    return wqkv_t, bqkv_r, wo_t, bo_r


@jax.jit
def multihead_attention(x, wqkv_t, bqkv_r, wo_t, bo_r):
    """x: (B, S, D); weights pre-regrouped by prepare_params()."""
    B, S, D = x.shape
    E = EMBED_DIM
    x_flat = x.reshape(B * S, D)    # fused into the jitted graph, not a separate dispatch

    grid_spec = pltpu.PrefetchScalarGridSpec(
        num_scalar_prefetch=0,
        grid=(1,),
        in_specs=[
            pl.BlockSpec((B * S, D), lambda i: (0, 0)),
            pl.BlockSpec((D, 3 * E), lambda i: (0, 0)),
            pl.BlockSpec((1, 3 * E), lambda i: (0, 0)),
            pl.BlockSpec((E, E), lambda i: (0, 0)),
            pl.BlockSpec((1, E), lambda i: (0, 0)),
        ],
        out_specs=pl.BlockSpec((B * S, E), lambda i: (0, 0)),
    )

    out_flat = pl.pallas_call(
        functools.partial(mha_kernel, batch=B, seq=S),
        out_shape=jax.ShapeDtypeStruct((B * S, E), x.dtype),
        grid_spec=grid_spec,
        compiler_params=pltpu.CompilerParams(
            dimension_semantics=("arbitrary",)),
    )(x_flat, wqkv_t, bqkv_r, wo_t, bo_r)

    return out_flat.reshape(B, S, E)


# ---------------- pure-JAX reference (mirrors the PyTorch forward) -------------
def reference_mha(x, w_qkv, b_qkv, w_o, b_o):
    B, S, D = x.shape
    qkv = jnp.einsum("bsd,ed->bse", x, w_qkv, precision=_HIGHEST) + b_qkv   # (B, S, 3E)
    qkv = qkv.reshape(B, S, NUM_HEADS, 3 * HEAD_DIM)
    qkv = jnp.transpose(qkv, (0, 2, 1, 3))                                  # (B, H, S, 3hd)
    q, k, v = jnp.split(qkv, 3, axis=-1)
    logits = jnp.einsum("bhqd,bhkd->bhqk", q, k,
                        precision=_HIGHEST) / math.sqrt(HEAD_DIM)
    attn = jax.nn.softmax(logits, axis=-1)
    vals = jnp.einsum("bhqk,bhkd->bhqd", attn, v, precision=_HIGHEST)       # (B, H, S, hd)
    vals = jnp.transpose(vals, (0, 2, 1, 3)).reshape(B, S, EMBED_DIM)
    return jnp.einsum("bse,fe->bsf", vals, w_o, precision=_HIGHEST) + b_o


def xavier_uniform(key, shape):
    fan_out, fan_in = shape
    bound = math.sqrt(6.0 / (fan_in + fan_out))
    return jax.random.uniform(key, shape, jnp.float32, -bound, bound)


if __name__ == "__main__":
    key = jax.random.PRNGKey(0)
    kx, kq, ko = jax.random.split(key, 3)

    # deterministic parameter init (mirrors xavier_uniform_ weights, zero bias)
    x = jax.random.normal(kx, (BATCH, SEQ, INPUT_DIM), jnp.float32)
    w_qkv = xavier_uniform(kq, (3 * EMBED_DIM, INPUT_DIM))   # nn.Linear weight layout
    b_qkv = jnp.zeros((3 * EMBED_DIM,), jnp.float32)
    w_o = xavier_uniform(ko, (EMBED_DIM, EMBED_DIM))
    b_o = jnp.zeros((EMBED_DIM,), jnp.float32)

    # One-time weight prep (outside the hot path), then the jitted kernel call.
    params = prepare_params(w_qkv, b_qkv, w_o, b_o)
    out = multihead_attention(x, *params)
    out = jax.block_until_ready(out)

    ref = reference_mha(x, w_qkv, b_qkv, w_o, b_o)
    assert out.shape == (BATCH, SEQ, EMBED_DIM)
    assert jnp.allclose(out, ref, atol=1e-4, rtol=1e-4), "mismatch vs reference"

    print("KERNEL_OK")
</pallas_src>

<mosaic_0001>
module attributes {stable_mosaic.version = 11 : i64} {
  func.func @mha_kernel(%arg0: i32, %arg1: memref<16x32xf32, #tpu.memory_space<vmem>>, %arg2: memref<32x96xf32, #tpu.memory_space<vmem>>, %arg3: memref<1x96xf32, #tpu.memory_space<vmem>>, %arg4: memref<32x32xf32, #tpu.memory_space<vmem>>, %arg5: memref<1x32xf32, #tpu.memory_space<vmem>>, %arg6: memref<16x32xf32, #tpu.memory_space<vmem>>) attributes {dimension_semantics = [#tpu.dimension_semantics<arbitrary>], iteration_bounds = array<i64: 1>, scalar_prefetch = 0 : i64, scratch_operands = 0 : i64, tpu.core_type = #tpu.core_type<tc>, window_params = [{pipeline_mode = #tpu.pipeline_mode<synchronous>, transform_indices = @transform_0, window_bounds = array<i64: 16, 32>}, {pipeline_mode = #tpu.pipeline_mode<synchronous>, transform_indices = @transform_1, window_bounds = array<i64: 32, 96>}, {pipeline_mode = #tpu.pipeline_mode<synchronous>, transform_indices = @transform_2, window_bounds = array<i64: 1, 96>}, {pipeline_mode = #tpu.pipeline_mode<synchronous>, transform_indices = @transform_3, window_bounds = array<i64: 32, 32>}, {pipeline_mode = #tpu.pipeline_mode<synchronous>, transform_indices = @transform_4, window_bounds = array<i64: 1, 32>}, {pipeline_mode = #tpu.pipeline_mode<synchronous>, transform_indices = @transform_5, window_bounds = array<i64: 16, 32>}]} {
    %c0 = arith.constant 0 : index
    %c0_0 = arith.constant 0 : index
    %0 = vector.load %arg1[%c0, %c0_0] : memref<16x32xf32, #tpu.memory_space<vmem>>, vector<16x32xf32>
    %c0_1 = arith.constant 0 : index
    %c0_2 = arith.constant 0 : index
    %1 = vector.load %arg2[%c0_1, %c0_2] : memref<32x96xf32, #tpu.memory_space<vmem>>, vector<32x96xf32>
    %cst = arith.constant dense<0.000000e+00> : vector<16x96xf32>
    %2 = tpu.matmul %0, %1, %cst {dimension_numbers = #tpu.dot_dimension_numbers<[1], [0], [0], [1], [0, 0, 1, 1], [], []>, precision = #tpu.contract_precision<fp32>} : vector<16x32xf32>, vector<32x96xf32>, vector<16x96xf32> -> vector<16x96xf32>
    %c0_3 = arith.constant 0 : index
    %c0_4 = arith.constant 0 : index
    %3 = vector.load %arg3[%c0_3, %c0_4] : memref<1x96xf32, #tpu.memory_space<vmem>>, vector<1x96xf32>
    %4 = vector.broadcast %3 : vector<1x96xf32> to vector<16x96xf32>
    %5 = arith.addf %2, %4 : vector<16x96xf32>
    %c0_5 = arith.constant 0 : index
    %c0_6 = arith.constant 0 : index
    %6 = vector.load %arg5[%c0_5, %c0_6] : memref<1x32xf32, #tpu.memory_space<vmem>>, vector<1x32xf32>
    %7 = vector.shape_cast %6 : vector<1x32xf32> to vector<1x32xf32>
    %8 = vector.broadcast %7 : vector<1x32xf32> to vector<16x32xf32>
    %9 = vector.extract_strided_slice %5 {offsets = [0, 0], sizes = [16, 8], strides = [1, 1]} : vector<16x96xf32> to vector<16x8xf32>
    %10 = vector.shape_cast %9 : vector<16x8xf32> to vector<2x8x8xf32>
    %11 = vector.extract_strided_slice %5 {offsets = [0, 32], sizes = [16, 8], strides = [1, 1]} : vector<16x96xf32> to vector<16x8xf32>
    %12 = vector.shape_cast %11 : vector<16x8xf32> to vector<2x8x8xf32>
    %13 = vector.extract_strided_slice %5 {offsets = [0, 64], sizes = [16, 8], strides = [1, 1]} : vector<16x96xf32> to vector<16x8xf32>
    %14 = vector.shape_cast %13 : vector<16x8xf32> to vector<2x8x8xf32>
    "tpu.trace_start"() <{level = 10 : i32, message = "bqd,bkd->bqk"}> : () -> ()
    %cst_7 = arith.constant dense<0.000000e+00> : vector<2x8x8xf32>
    %15 = tpu.matmul %10, %12, %cst_7 {dimension_numbers = #tpu.dot_dimension_numbers<[2], [2], [1], [1], [0, 0, 0, 1, 1, 1], [0], [0]>, precision = #tpu.contract_precision<fp32>} : vector<2x8x8xf32>, vector<2x8x8xf32>, vector<2x8x8xf32> -> vector<2x8x8xf32>
    "tpu.trace_stop"() : () -> ()
    %cst_8 = arith.constant dense<0xFF800000> : vector<2x8xf32>
    %16 = vector.multi_reduction <maximumf>, %15, %cst_8 [2] : vector<2x8x8xf32> to vector<2x8xf32>
    %17 = vector.shape_cast %16 : vector<2x8xf32> to vector<2x8x1xf32>
    %18 = vector.broadcast %17 : vector<2x8x1xf32> to vector<2x8x8xf32>
    %19 = arith.subf %15, %18 : vector<2x8x8xf32>
    %20 = math.exp %19 : vector<2x8x8xf32>
    %cst_9 = arith.constant dense<0.000000e+00> : vector<2x8xf32>
    %21 = vector.multi_reduction <add>, %20, %cst_9 [2] : vector<2x8x8xf32> to vector<2x8xf32>
    %22 = vector.shape_cast %21 : vector<2x8xf32> to vector<2x8x1xf32>
    %23 = vector.broadcast %22 : vector<2x8x1xf32> to vector<2x8x8xf32>
    %24 = arith.divf %20, %23 : vector<2x8x8xf32>
    "tpu.trace_start"() <{level = 10 : i32, message = "bqk,bkd->bqd"}> : () -> ()
    %cst_10 = arith.constant dense<0.000000e+00> : vector<2x8x8xf32>
    %25 = tpu.matmul %24, %14, %cst_10 {dimension_numbers = #tpu.dot_dimension_numbers<[2], [1], [1], [2], [0, 0, 0, 1, 1, 2], [0], [0]>, precision = #tpu.contract_precision<fp32>} : vector<2x8x8xf32>, vector<2x8x8xf32>, vector<2x8x8xf32> -> vector<2x8x8xf32>
    "tpu.trace_stop"() : () -> ()
    %26 = vector.shape_cast %25 : vector<2x8x8xf32> to vector<16x8xf32>
    %c0_11 = arith.constant 0 : index
    %c0_12 = arith.constant 0 : index
    %27 = vector.load %arg4[%c0_11, %c0_12] : memref<32x32xf32, #tpu.memory_space<vmem>>, vector<8x32xf32>
    %cst_13 = arith.constant dense<0.000000e+00> : vector<16x32xf32>
    %28 = tpu.matmul %26, %27, %cst_13 {dimension_numbers = #tpu.dot_dimension_numbers<[1], [0], [0], [1], [0, 0, 1, 1], [], []>, precision = #tpu.contract_precision<fp32>} : vector<16x8xf32>, vector<8x32xf32>, vector<16x32xf32> -> vector<16x32xf32>
    %29 = arith.addf %8, %28 : vector<16x32xf32>
    %30 = vector.extract_strided_slice %5 {offsets = [0, 8], sizes = [16, 8], strides = [1, 1]} : vector<16x96xf32> to vector<16x8xf32>
    %31 = vector.shape_cast %30 : vector<16x8xf32> to vector<2x8x8xf32>
    %32 = vector.extract_strided_slice %5 {offsets = [0, 40], sizes = [16, 8], strides = [1, 1]} : vector<16x96xf32> to vector<16x8xf32>
    %33 = vector.shape_cast %32 : vector<16x8xf32> to vector<2x8x8xf32>
    %34 = vector.extract_strided_slice %5 {offsets = [0, 72], sizes = [16, 8], strides = [1, 1]} : vector<16x96xf32> to vector<16x8xf32>
    %35 = vector.shape_cast %34 : vector<16x8xf32> to vector<2x8x8xf32>
    "tpu.trace_start"() <{level = 10 : i32, message = "bqd,bkd->bqk"}> : () -> ()
    %cst_14 = arith.constant dense<0.000000e+00> : vector<2x8x8xf32>
    %36 = tpu.matmul %31, %33, %cst_14 {dimension_numbers = #tpu.dot_dimension_numbers<[2], [2], [1], [1], [0, 0, 0, 1, 1, 1], [0], [0]>, precision = #tpu.contract_precision<fp32>} : vector<2x8x8xf32>, vector<2x8x8xf32>, vector<2x8x8xf32> -> vector<2x8x8xf32>
    "tpu.trace_stop"() : () -> ()
    %cst_15 = arith.constant dense<0xFF800000> : vector<2x8xf32>
    %37 = vector.multi_reduction <maximumf>, %36, %cst_15 [2] : vector<2x8x8xf32> to vector<2x8xf32>
    %38 = vector.shape_cast %37 : vector<2x8xf32> to vector<2x8x1xf32>
    %39 = vector.broadcast %38 : vector<2x8x1xf32> to vector<2x8x8xf32>
    %40 = arith.subf %36, %39 : vector<2x8x8xf32>
    %41 = math.exp %40 : vector<2x8x8xf32>
    %cst_16 = arith.constant dense<0.000000e+00> : vector<2x8xf32>
    %42 = vector.multi_reduction <add>, %41, %cst_16 [2] : vector<2x8x8xf32> to vector<2x8xf32>
    %43 = vector.shape_cast %42 : vector<2x8xf32> to vector<2x8x1xf32>
    %44 = vector.broadcast %43 : vector<2x8x1xf32> to vector<2x8x8xf32>
    %45 = arith.divf %41, %44 : vector<2x8x8xf32>
    "tpu.trace_start"() <{level = 10 : i32, message = "bqk,bkd->bqd"}> : () -> ()
    %cst_17 = arith.constant dense<0.000000e+00> : vector<2x8x8xf32>
    %46 = tpu.matmul %45, %35, %cst_17 {dimension_numbers = #tpu.dot_dimension_numbers<[2], [1], [1], [2], [0, 0, 0, 1, 1, 2], [0], [0]>, precision = #tpu.contract_precision<fp32>} : vector<2x8x8xf32>, vector<2x8x8xf32>, vector<2x8x8xf32> -> vector<2x8x8xf32>
    "tpu.trace_stop"() : () -> ()
    %47 = vector.shape_cast %46 : vector<2x8x8xf32> to vector<16x8xf32>
    %c8 = arith.constant 8 : index
    %c0_18 = arith.constant 0 : index
    %48 = vector.load %arg4[%c8, %c0_18] : memref<32x32xf32, #tpu.memory_space<vmem>>, vector<8x32xf32>
    %cst_19 = arith.constant dense<0.000000e+00> : vector<16x32xf32>
    %49 = tpu.matmul %47, %48, %cst_19 {dimension_numbers = #tpu.dot_dimension_numbers<[1], [0], [0], [1], [0, 0, 1, 1], [], []>, precision = #tpu.contract_precision<fp32>} : vector<16x8xf32>, vector<8x32xf32>, vector<16x32xf32> -> vector<16x32xf32>
    %50 = arith.addf %29, %49 : vector<16x32xf32>
    %51 = vector.extract_strided_slice %5 {offsets = [0, 16], sizes = [16, 8], strides = [1, 1]} : vector<16x96xf32> to vector<16x8xf32>
    %52 = vector.shape_cast %51 : vector<16x8xf32> to vector<2x8x8xf32>
    %53 = vector.extract_strided_slice %5 {offsets = [0, 48], sizes = [16, 8], strides = [1, 1]} : vector<16x96xf32> to vector<16x8xf32>
    %54 = vector.shape_cast %53 : vector<16x8xf32> to vector<2x8x8xf32>
    %55 = vector.extract_strided_slice %5 {offsets = [0, 80], sizes = [16, 8], strides = [1, 1]} : vector<16x96xf32> to vector<16x8xf32>
    %56 = vector.shape_cast %55 : vector<16x8xf32> to vector<2x8x8xf32>
    "tpu.trace_start"() <{level = 10 : i32, message = "bqd,bkd->bqk"}> : () -> ()
    %cst_20 = arith.constant dense<0.000000e+00> : vector<2x8x8xf32>
    %57 = tpu.matmul %52, %54, %cst_20 {dimension_numbers = #tpu.dot_dimension_numbers<[2], [2], [1], [1], [0, 0, 0, 1, 1, 1], [0], [0]>, precision = #tpu.contract_precision<fp32>} : vector<2x8x8xf32>, vector<2x8x8xf32>, vector<2x8x8xf32> -> vector<2x8x8xf32>
    "tpu.trace_stop"() : () -> ()
    %cst_21 = arith.constant dense<0xFF800000> : vector<2x8xf32>
    %58 = vector.multi_reduction <maximumf>, %57, %cst_21 [2] : vector<2x8x8xf32> to vector<2x8xf32>
    %59 = vector.shape_cast %58 : vector<2x8xf32> to vector<2x8x1xf32>
    %60 = vector.broadcast %59 : vector<2x8x1xf32> to vector<2x8x8xf32>
    %61 = arith.subf %57, %60 : vector<2x8x8xf32>
    %62 = math.exp %61 : vector<2x8x8xf32>
    %cst_22 = arith.constant dense<0.000000e+00> : vector<2x8xf32>
    %63 = vector.multi_reduction <add>, %62, %cst_22 [2] : vector<2x8x8xf32> to vector<2x8xf32>
    %64 = vector.shape_cast %63 : vector<2x8xf32> to vector<2x8x1xf32>
    %65 = vector.broadcast %64 : vector<2x8x1xf32> to vector<2x8x8xf32>
    %66 = arith.divf %62, %65 : vector<2x8x8xf32>
    "tpu.trace_start"() <{level = 10 : i32, message = "bqk,bkd->bqd"}> : () -> ()
    %cst_23 = arith.constant dense<0.000000e+00> : vector<2x8x8xf32>
    %67 = tpu.matmul %66, %56, %cst_23 {dimension_numbers = #tpu.dot_dimension_numbers<[2], [1], [1], [2], [0, 0, 0, 1, 1, 2], [0], [0]>, precision = #tpu.contract_precision<fp32>} : vector<2x8x8xf32>, vector<2x8x8xf32>, vector<2x8x8xf32> -> vector<2x8x8xf32>
    "tpu.trace_stop"() : () -> ()
    %68 = vector.shape_cast %67 : vector<2x8x8xf32> to vector<16x8xf32>
    %c16 = arith.constant 16 : index
    %c0_24 = arith.constant 0 : index
    %69 = vector.load %arg4[%c16, %c0_24] : memref<32x32xf32, #tpu.memory_space<vmem>>, vector<8x32xf32>
    %cst_25 = arith.constant dense<0.000000e+00> : vector<16x32xf32>
    %70 = tpu.matmul %68, %69, %cst_25 {dimension_numbers = #tpu.dot_dimension_numbers<[1], [0], [0], [1], [0, 0, 1, 1], [], []>, precision = #tpu.contract_precision<fp32>} : vector<16x8xf32>, vector<8x32xf32>, vector<16x32xf32> -> vector<16x32xf32>
    %71 = arith.addf %50, %70 : vector<16x32xf32>
    %72 = vector.extract_strided_slice %5 {offsets = [0, 24], sizes = [16, 8], strides = [1, 1]} : vector<16x96xf32> to vector<16x8xf32>
    %73 = vector.shape_cast %72 : vector<16x8xf32> to vector<2x8x8xf32>
    %74 = vector.extract_strided_slice %5 {offsets = [0, 56], sizes = [16, 8], strides = [1, 1]} : vector<16x96xf32> to vector<16x8xf32>
    %75 = vector.shape_cast %74 : vector<16x8xf32> to vector<2x8x8xf32>
    %76 = vector.extract_strided_slice %5 {offsets = [0, 88], sizes = [16, 8], strides = [1, 1]} : vector<16x96xf32> to vector<16x8xf32>
    %77 = vector.shape_cast %76 : vector<16x8xf32> to vector<2x8x8xf32>
    "tpu.trace_start"() <{level = 10 : i32, message = "bqd,bkd->bqk"}> : () -> ()
    %cst_26 = arith.constant dense<0.000000e+00> : vector<2x8x8xf32>
    %78 = tpu.matmul %73, %75, %cst_26 {dimension_numbers = #tpu.dot_dimension_numbers<[2], [2], [1], [1], [0, 0, 0, 1, 1, 1], [0], [0]>, precision = #tpu.contract_precision<fp32>} : vector<2x8x8xf32>, vector<2x8x8xf32>, vector<2x8x8xf32> -> vector<2x8x8xf32>
    "tpu.trace_stop"() : () -> ()
    %cst_27 = arith.constant dense<0xFF800000> : vector<2x8xf32>
    %79 = vector.multi_reduction <maximumf>, %78, %cst_27 [2] : vector<2x8x8xf32> to vector<2x8xf32>
    %80 = vector.shape_cast %79 : vector<2x8xf32> to vector<2x8x1xf32>
    %81 = vector.broadcast %80 : vector<2x8x1xf32> to vector<2x8x8xf32>
    %82 = arith.subf %78, %81 : vector<2x8x8xf32>
    %83 = math.exp %82 : vector<2x8x8xf32>
    %cst_28 = arith.constant dense<0.000000e+00> : vector<2x8xf32>
    %84 = vector.multi_reduction <add>, %83, %cst_28 [2] : vector<2x8x8xf32> to vector<2x8xf32>
    %85 = vector.shape_cast %84 : vector<2x8xf32> to vector<2x8x1xf32>
    %86 = vector.broadcast %85 : vector<2x8x1xf32> to vector<2x8x8xf32>
    %87 = arith.divf %83, %86 : vector<2x8x8xf32>
    "tpu.trace_start"() <{level = 10 : i32, message = "bqk,bkd->bqd"}> : () -> ()
    %cst_29 = arith.constant dense<0.000000e+00> : vector<2x8x8xf32>
    %88 = tpu.matmul %87, %77, %cst_29 {dimension_numbers = #tpu.dot_dimension_numbers<[2], [1], [1], [2], [0, 0, 0, 1, 1, 2], [0], [0]>, precision = #tpu.contract_precision<fp32>} : vector<2x8x8xf32>, vector<2x8x8xf32>, vector<2x8x8xf32> -> vector<2x8x8xf32>
    "tpu.trace_stop"() : () -> ()
    %89 = vector.shape_cast %88 : vector<2x8x8xf32> to vector<16x8xf32>
    %c24 = arith.constant 24 : index
    %c0_30 = arith.constant 0 : index
    %90 = vector.load %arg4[%c24, %c0_30] : memref<32x32xf32, #tpu.memory_space<vmem>>, vector<8x32xf32>
    %cst_31 = arith.constant dense<0.000000e+00> : vector<16x32xf32>
    %91 = tpu.matmul %89, %90, %cst_31 {dimension_numbers = #tpu.dot_dimension_numbers<[1], [0], [0], [1], [0, 0, 1, 1], [], []>, precision = #tpu.contract_precision<fp32>} : vector<16x8xf32>, vector<8x32xf32>, vector<16x32xf32> -> vector<16x32xf32>
    %92 = arith.addf %71, %91 : vector<16x32xf32>
    %c0_32 = arith.constant 0 : index
    %c0_33 = arith.constant 0 : index
    %93 = vector.load %arg6[%c0_32, %c0_33] : memref<16x32xf32, #tpu.memory_space<vmem>>, vector<16x32xf32>
    tpu.vector_store %arg6[%c0_32, %c0_33], %92 {strides = array<i32>} : memref<16x32xf32, #tpu.memory_space<vmem>>, vector<16x32xf32>,
    return
  }
  func.func @transform_0(%arg0: i32) -> (i32, i32) {
    %c0_i32 = arith.constant 0 : i32
    %c0_i32_0 = arith.constant 0 : i32
    %c0_i32_1 = arith.constant 0 : i32
    return %c0_i32, %c0_i32_0 : i32, i32
  }
  func.func @transform_1(%arg0: i32) -> (i32, i32) {
    %c0_i32 = arith.constant 0 : i32
    %c0_i32_0 = arith.constant 0 : i32
    %c0_i32_1 = arith.constant 0 : i32
    return %c0_i32, %c0_i32_0 : i32, i32
  }
  func.func @transform_2(%arg0: i32) -> (i32, i32) {
    %c0_i32 = arith.constant 0 : i32
    %c0_i32_0 = arith.constant 0 : i32
    %c0_i32_1 = arith.constant 0 : i32
    return %c0_i32, %c0_i32_0 : i32, i32
  }
  func.func @transform_3(%arg0: i32) -> (i32, i32) {
    %c0_i32 = arith.constant 0 : i32
    %c0_i32_0 = arith.constant 0 : i32
    %c0_i32_1 = arith.constant 0 : i32
    return %c0_i32, %c0_i32_0 : i32, i32
  }
  func.func @transform_4(%arg0: i32) -> (i32, i32) {
    %c0_i32 = arith.constant 0 : i32
    %c0_i32_0 = arith.constant 0 : i32
    %c0_i32_1 = arith.constant 0 : i32
    return %c0_i32, %c0_i32_0 : i32, i32
  }
  func.func @transform_5(%arg0: i32) -> (i32, i32) {
    %c0_i32 = arith.constant 0 : i32
    %c0_i32_0 = arith.constant 0 : i32
    %c0_i32_1 = arith.constant 0 : i32
    return %c0_i32, %c0_i32_0 : i32, i32
  }
}

</mosaic_0001>

<bundles_post_ra>
// kernel: multihead_attention.1
= control target key start
LH: loop header
LB: loop body
LE: loop exit
PB: predicated region body
PF: predicated region fallthrough
CT: control target
= control target key end

     0   :  { %10 = vsyncpa [#allocation3], 0  ;;  %s4145_s0 = inlined_call_operand.hbm [shape: f32[16,32], index: 0, kind: input, shape index: {}]   ;;  %s4146_s1 = inlined_call_operand.hbm [shape: f32[32,96], index: 1, kind: input, shape index: {}]   ;;  %s4147_s2 = inlined_call_operand.vmem [shape: f32[1,96], index: 2, kind: input, shape index: {}]   ;;  %s4148_s3 = inlined_call_operand.hbm [shape: f32[32,32], index: 3, kind: input, shape index: {}]   ;;  %s4149_s4 = inlined_call_operand.vmem [shape: f32[1,32], index: 4, kind: input, shape index: {}]   ;;  %s4150_s5 = inlined_call_operand.hbm [shape: f32[16,32], index: 5, kind: output, shape index: {}]  }
   0x1   :  { %11 = vsyncpa [#allocation6], 0 }
   0x2   :  { %12 = vsyncpa [#allocation4], 0  ;;  %s30_s20 = sshll.u32 %s4146_s1, 4  ;;  %s3871_s21 = smov [#allocation5]   ;;  %s31_s20 = int_to_ptr.hbm [resolvable:$true] %s30_s20 }
   0x3   :  { %s32_s22 = sshll.u32 %s3871_s21, 4  ;;  %s17_s25 = sshll.u32 %s4145_s0, 4  ;;  %s33_s22 = int_to_ptr.vmem [resolvable:$true] %s32_s22  ;;  %s18_s25 = int_to_ptr.hbm [resolvable:$true] %s17_s25 }
   0x4   :  { %s3872_s26 = smov 128   ;;  %s3873_s27 = smov 8  }
   0x5   :  { %38 = dma.hbm_to_vmem [thread:$0]  %s31_s20, 512, %s33_s22, [#allocation6], %s3872_s26, %s3872_s26, %s3873_s27  }
   0x6   :  { %s3874_s28 = smov [#allocation2]   ;;  %s45_s1 = sshll.u32 %s4148_s3, 4  ;;  %s46_s1 = int_to_ptr.hbm [resolvable:$true] %s45_s1 }
   0x7   :  { %s19_s29 = sshll.u32 %s3874_s28, 4  ;;  %s3875_s0 = smov [#allocation7]   ;;  %s20_s29 = int_to_ptr.vmem [resolvable:$true] %s19_s29 }
   0x8   :  { %25 = dma.hbm_to_vmem [thread:$0]  %s18_s25, 256, %s20_s29, [#allocation3], %s3872_s26, %s3872_s26, %s3873_s27  }
   0x9   :  { %s47_s7 = sshll.u32 %s3875_s0, 4  ;;  %s48_s7 = int_to_ptr.vmem [resolvable:$true] %s47_s7 }
   0xa   :  { %53 = dma.hbm_to_vmem [thread:$0]  %s46_s1, 512, %s48_s7, [#allocation6], %s3872_s26, %s3872_s26, %s3873_s27  }
   0xb   :  { %3865 = dma.done.wait [#allocation3], 256  }
   0xc   :  { %3866 = vsyncadd [#allocation3], 4294967040 }
   0xd   :  { %3867 = dma.done.wait [#allocation6], 1024  }
   0xe   :  { %3868 = vsyncadd [#allocation6], 4294966272  ;;  %vm78_vm0 = vcmask 261120   ;;  %v73_v0 = vld [vmem:[#allocation5 + $0x18] sm:$0xff]  ;;  %v72_v1 = vld [vmem:[#allocation5 + $0x10] sm:$0xff]  ;;  %s3876_s9 = smov 96  }
   0xf   :  { %v71_v2 = vld [vmem:[#allocation5 + $0x8] sm:$0xff]  ;;  %v97_v3 = vand.u32 4294901760, %v73_v0  ;;  %v3936_v4 = vand.u32 4294901760, %v72_v1  ;;  %v70_v6 = vld [vmem:[#allocation5] sm:$0xff]  ;;  %v69_v7 = vld [vmem:[#allocation2 + $0x8] sm:$0xff]  ;;  %s3878_s10 = smov 120  }
  0x10   :  { %v3938_v5 = vand.u32 4294901760, %v71_v2  ;;  %v68_v8 = vld [vmem:[#allocation2] sm:$0xff]  ;;  %v3940_v9 = vand.u32 4294901760, %v70_v6  ;;  %v83_v10 = vsel %vm78_vm0, %v69_v7, 0  ;;  %s3879_s11 = smov 88   ;;  %vm308_vm1 = vcmask 64512  }
  0x11   :  { %v80_v11 = vsel %vm78_vm0, %v68_v8, 0  ;;  %3710 = vmatpush.msra.mxu2 %v97_v3  ;;  %v135_v12 = vsub.f32 %v73_v0, %v97_v3  ;;  %v3944_v13 = vand.u32 4294901760, %v83_v10  ;;  %v141_v14 = vsub.f32 %v72_v1, %v3936_v4  ;;  %98 = vmatpush.msra.mxu0 %v97_v3  ;;  %v3735_v39 = vld [vmem:[%s4147_s2] ss:$0 sm:$0xff]  ;;  %s3877_s2 = smov 64   ;;  %s3880_s12 = smov 56  }
  0x12   :  { %v147_v15 = vsub.f32 %v71_v2, %v3938_v5  ;;  %v153_v16 = vsub.f32 %v70_v6, %v3940_v9  ;;  %v105_v17 = vand.u32 4294901760, %v80_v11  ;;  %s3881_s13 = smov 112   ;;  %s3882_s14 = smov 80  }
  0x13   :  { %3711 = vmatpush.msra.mxu2 %v3936_v4  ;;  %v136_v18 = vand.u32 4294901760, %v135_v12  ;;  %v114_v19 = vsub.f32 %v83_v10, %v3944_v13  ;;  %v142_v20 = vand.u32 4294901760, %v141_v14  ;;  %100 = vmatpush.msra.mxu0 %v3936_v4  ;;  %s3883_s15 = smov 48   ;;  %s3884_s16 = smov 104  }
  0x14   :  { %v148_v21 = vand.u32 4294901760, %v147_v15  ;;  %v154_v22 = vand.u32 4294901760, %v153_v16  ;;  %v106_v23 = vsub.f32 %v80_v11, %v105_v17  ;;  %s3885_s17 = smov 72   ;;  %s3887_s20 = smov [#allocation8]  }
  0x15   :  { %3712 = vmatpush.msra.mxu2 %v3938_v5  ;;  %v137_v24 = vsub.f32 %v135_v12, %v136_v18  ;;  %v115_v25 = vand.u32 4294901760, %v114_v19  ;;  %v143_v26 = vsub.f32 %v141_v14, %v142_v20  ;;  %102 = vmatpush.msra.mxu0 %v3938_v5  ;;  %s3694_s21 = sshll.u32 %s3887_s20, 4  ;;  %s3696_s24 = sshll.u32 %s4150_s5, 4  ;;  %s3695_s21 = int_to_ptr.vmem [resolvable:$true] %s3694_s21  ;;  %s3697_s24 = int_to_ptr.hbm [resolvable:$true] %s3696_s24 }
  0x16   :  { %v149_v27 = vsub.f32 %v147_v15, %v148_v21  ;;  %v107_v28 = vand.u32 4294901760, %v106_v23  ;;  %v155_v32 = vsub.f32 %v153_v16, %v154_v22 }
  0x17   :  { %3713 = vmatpush.msra.mxu2 %v3940_v9  ;;  %v138_v29 = vand.u32 4294901760, %v137_v24  ;;  %v116_v30 = vsub.f32 %v114_v19, %v115_v25  ;;  %v144_v31 = vand.u32 4294901760, %v143_v26  ;;  %104 = vmatpush.msra.mxu0 %v3940_v9 }
  0x18   :  { %v108_v33 = vsub.f32 %v106_v23, %v107_v28  ;;  %v150_v35 = vand.u32 4294901760, %v149_v27  ;;  %v156_v37 = vand.u32 4294901760, %v155_v32 }
  0x19   :  { %181 = vmatpush.msrb.mxu2 %v135_v12  ;;  %250 = vmatpush.msrb.mxu0 %v136_v18  ;;  %v117_v34 = vand.u32 4294901760, %v116_v30 }
  0x1a   :  { %3714 = vmatpush.msra.mxu3 %v138_v29  ;;  %139 = vmatpush.msra.mxu1 %v138_v29  ;;  %v109_v36 = vand.u32 4294901760, %v108_v33 }
  0x1b   :  { %184 = vmatpush.msrb.mxu2 %v141_v14  ;;  %254 = vmatpush.msrb.mxu0 %v142_v20 }
  0x1c   :  { %118 = vmatmul.f32.vlgmr.msra.gmra.mxu2 %v117_v34  ;;  %3715 = vmatpush.msra.mxu3 %v144_v31 }
  0x1d   :  { %187 = vmatpush.msrb.mxu2 %v147_v15  ;;  %145 = vmatpush.msra.mxu1 %v144_v31 }
  0x1e   :  { %3716 = vmatpush.msra.mxu3 %v150_v35  ;;  %110 = vmatmul.f32.vlgmr.msra.gmra.mxu0 %v109_v36 }
  0x1f   :  { %190 = vmatpush.msrb.mxu2 %v153_v16  ;;  %151 = vmatpush.msra.mxu1 %v150_v35 }
  0x20   :  { %3717 = vmatpush.msra.mxu3 %v156_v37  ;;  %258 = vmatpush.msrb.mxu0 %v148_v21 }
  0x21   :  { %163 = vmatmul.f32.vlgmr.msra.gmra.mxu3 %v3944_v13  ;;  %157 = vmatpush.msra.mxu1 %v156_v37 }
  0x22   :  { %215 = vmatpush.msrb.mxu3 %v97_v3  ;;  %159 = vmatmul.f32.vlgmr.msra.gmra.mxu1 %v105_v17 }
  0x23   :  { %285 = vmatpush.msrb.mxu1 %v97_v3  ;;  %262 = vmatpush.msrb.mxu0 %v154_v22 }
  0x24   :  { %193 = vmatmul.f32.vlgmr.msrb.gmra.mxu2 %v106_v23  ;;  %217 = vmatpush.msrb.mxu3 %v3936_v4 }
  0x25   :  { %287 = vmatpush.msrb.mxu1 %v3936_v4 }
  0x26   :  { %219 = vmatpush.msrb.mxu3 %v3938_v5  ;;  %264 = vmatmul.f32.vlgmr.msrb.gmra.mxu0 %v105_v17 }
  0x27   :  { %289 = vmatpush.msrb.mxu1 %v3938_v5 }
  0x28   :  { %221 = vmatpush.msrb.mxu3 %v3940_v9 }
  0x29   :  { %225 = vmatmul.f32.vlgmr.msrb.gmra.mxu3 %v107_v28  ;;  %291 = vmatpush.msrb.mxu1 %v3940_v9 }
  0x2a   :  { %293 = vmatmul.f32.vlgmr.msrb.gmra.mxu1 %v105_v17 }
  0x2c   :  { %198 = vmatmul.f32.gmra.mxu2 %v114_v19 }
  0x2e   :  { %268 = vmatmul.f32.gmra.mxu0 %v3944_v13 }
  0x31   :  { %231 = vmatmul.f32.gmra.mxu3 %v115_v25 }
  0x32   :  { %297 = vmatmul.f32.gmra.mxu1 %v3944_v13 }
  0x9b   :  { %v111_v38 = vpop.f32.mrf.mxu0 }
  0x9c   :  { %v112_v41 = vadd.f32 %v3735_v39, %v111_v38 }
  0x9f   :  { %v119_v40 = vpop.f32.mrf.mxu2  ;;  %v160_v42 = vpop.f32.mrf.mxu1 }
  0xa0   :  { %v161_v44 = vadd.f32 %v160_v42, %v112_v41  ;;  %v120_v50 = vadd.f32 %v3735_v39, %v119_v40 }
  0xa3   :  { %v265_v47 = vpop.f32.mrf.mxu0 }
  0xa4   :  { %v164_v43 = vpop.f32.mrf.mxu3 }
  0xa5   :  { %v165_v54 = vadd.f32 %v164_v43, %v120_v50 }
  0xa7   :  { %v194_v45 = vpop.f32.mrf.mxu2  ;;  %v294_v49 = vpop.f32.mrf.mxu1 }
  0xa8   :  { %v195_v46 = vadd.f32 %v194_v45, %v161_v44 }
  0xab   :  { %v269_v58 = vpop.f32.mrf.mxu0 }
  0xac   :  { %v226_v48 = vpop.f32.mrf.mxu3 }
  0xad   :  { %v227_v51 = vadd.f32 %v226_v48, %v195_v46 }
  0xaf   :  { %v266_v52 = vadd.f32 %v265_v47, %v227_v51  ;;  %v199_v53 = vpop.f32.mrf.mxu2  ;;  %v298_v60 = vpop.f32.mrf.mxu1 }
  0xb0   :  { %v200_v56 = vadd.f32 %v199_v53, %v165_v54 }
  0xb1   :  { %v3968_v55 = vadd.f32 %v294_v49, %v266_v52 }
  0xb3   :  { %306 = vrot.lane.b32.xlu0 %v3968_v55, %s3876_s9  ;;  %v309_v63 = vsel %vm308_vm1, %v3968_v55, 0 }
  0xb4   :  { %v232_v57 = vpop.f32.mrf.mxu3  ;;  %v330_v0 = vand.u32 4294901760, %v309_v63 }
  0xb5   :  { %v233_v59 = vadd.f32 %v232_v57, %v200_v56 }
  0xb6   :  { %v331_v1 = vsub.f32 %v309_v63, %v330_v0 }
  0xb7   :  { %v270_v61 = vadd.f32 %v269_v58, %v233_v59 }
  0xb8   :  { %v332_v2 = vand.u32 4294901760, %v331_v1 }
  0xb9   :  { %v3971_v62 = vadd.f32 %v298_v60, %v270_v61 }
  0xba   :  { %v333_v5 = vsub.f32 %v331_v1, %v332_v2 }
  0xbb   :  { %460 = vrot.lane.b32.xlu0 %v3971_v62, %s3876_s9  ;;  %v462_v7 = vsel %vm308_vm1, %v3971_v62, 0 }
  0xbc   :  { %v334_v9 = vand.u32 4294901760, %v333_v5  ;;  %v483_v10 = vand.u32 4294901760, %v462_v7 }
  0xbe   :  { %v484_v15 = vsub.f32 %v462_v7, %v483_v10 }
  0xc0   :  { %v485_v19 = vand.u32 4294901760, %v484_v15 }
  0xc2   :  { %v486_v24 = vsub.f32 %v484_v15, %v485_v19 }
  0xc3   :  { %660 = vrot.lane.b32.xlu0 %v3968_v55, %s3877_s2 }
  0xc4   :  { %v487_v28 = vand.u32 4294901760, %v486_v24 }
  0xcb   :  { %1150 = vrot.lane.b32.xlu0 %v3968_v55, %s3878_s10 }
  0xd3   :  { %1306 = vrot.lane.b32.xlu0 %v3971_v62, %s3879_s11 }
  0xdb   :  { %1304 = vrot.lane.b32.xlu0 %v3971_v62, %s3878_s10 }
 0x125   :  { %v307_v3 = vpop.permute.xlu0 %306 }
 0x126   :  { %v311_v4 = vsel %vm308_vm1, %v307_v3, 0 }
 0x127   :  { %v328_v6 = vand.u32 4294901760, %v311_v4 }
 0x129   :  { %v355_v8 = vsub.f32 %v311_v4, %v328_v6  ;;  %329 = vmatpush.xpose.msra.mxu2 %v328_v6  ;;  %453 = vmatpush.xpose.msra.mxu1 %v328_v6 }
 0x12b   :  { %v356_v11 = vand.u32 4294901760, %v355_v8 }
 0x12c   :  { %335 = vmatmul.f32.vlgmr.msra.gmra.mxu2 %v334_v9  ;;  %455 = vmatmul.f32.vlgmr.msra.gmra.mxu1 %v330_v0 }
 0x12d   :  { %382 = vmatpush.xpose.msrb.mxu2 %v355_v8  ;;  %v357_v12 = vsub.f32 %v355_v8, %v356_v11  ;;  %431 = vmatpush.xpose.msra.mxu0 %v356_v11  ;;  %v461_v13 = vpop.permute.xlu0 %460 }
 0x12e   :  { %v464_v14 = vsel %vm308_vm1, %v461_v13, 0 }
 0x12f   :  { %v358_v16 = vand.u32 4294901760, %v357_v12  ;;  %v481_v17 = vand.u32 4294901760, %v464_v14 }
 0x130   :  { %433 = vmatmul.f32.vlgmr.msra.gmra.mxu0 %v330_v0 }
 0x131   :  { %v508_v18 = vsub.f32 %v464_v14, %v481_v17  ;;  %359 = vmatpush.xpose.msra.mxu3 %v358_v16  ;;  %482 = vmatpush.xpose.msra.mxu2 %v481_v17 }
 0x132   :  { %558 = vmatpush.xpose.msrb.mxu1 %v481_v17 }
 0x133   :  { %v509_v20 = vand.u32 4294901760, %v508_v18  ;;  %535 = vmatpush.xpose.msrb.mxu0 %v508_v18 }
 0x134   :  { %361 = vmatmul.f32.vlgmr.msra.gmra.mxu3 %v330_v0  ;;  %385 = vmatmul.f32.vlgmr.msrb.gmra.mxu2 %v331_v1 }
 0x135   :  { %405 = vmatpush.xpose.msrb.mxu3 %v328_v6  ;;  %v510_v21 = vsub.f32 %v508_v18, %v509_v20  ;;  %562 = vmatmul.f32.vlgmr.msrb.gmra.mxu1 %v485_v19  ;;  %v661_v22 = vpop.permute.xlu0 %660 }
 0x136   :  { %584 = vmatpush.xpose.msrb.mxu2 %v509_v20  ;;  %v681_v23 = vand.u32 4294901760, %v661_v22 }
 0x137   :  { %v511_v25 = vand.u32 4294901760, %v510_v21 }
 0x138   :  { %v708_v26 = vsub.f32 %v661_v22, %v681_v23  ;;  %538 = vmatmul.f32.vlgmr.msrb.gmra.mxu0 %v484_v15 }
 0x139   :  { %682 = vmatpush.msra.mxu0 %v681_v23  ;;  %512 = vmatpush.xpose.msra.mxu3 %v511_v25 }
 0x13a   :  { %v709_v27 = vand.u32 4294901760, %v708_v26 }
 0x13c   :  { %v710_v29 = vsub.f32 %v708_v26, %v709_v27  ;;  %409 = vmatmul.f32.vlgmr.msrb.gmra.mxu3 %v332_v2  ;;  %488 = vmatmul.f32.vlgmr.msra.gmra.mxu2 %v487_v28 }
 0x13d   :  { %606 = vmatpush.xpose.msrb.mxu3 %v481_v17  ;;  %735 = vmatpush.msra.mxu2 %v708_v26 }
 0x13e   :  { %v711_v30 = vand.u32 4294901760, %v710_v29  ;;  %784 = vmatpush.msrb.mxu0 %v709_v27 }
 0x140   :  { %712 = vmatpush.msra.mxu1 %v711_v30 }
 0x142   :  { %806 = vmatpush.msrb.mxu1 %v681_v23 }
 0x144   :  { %514 = vmatmul.f32.vlgmr.msra.gmra.mxu3 %v483_v10  ;;  %586 = vmatmul.f32.vlgmr.msrb.gmra.mxu2 %v483_v10 }
 0x145   :  { %758 = vmatpush.msra.mxu3 %v681_v23 }
 0x14c   :  { %608 = vmatmul.f32.vlgmr.msrb.gmra.mxu3 %v483_v10 }
 0x1a9   :  { %v456_v39 = vpop.f32.mrf.mxu1 }
 0x1ad   :  { %v434_v36 = vpop.f32.mrf.mxu0 }
 0x1af   :  { %v336_v31 = vpop.f32.mrf.mxu2 }
 0x1b2   :  { %v563_v48 = vpop.f32.mrf.mxu1 }
 0x1b5   :  { %v539_v46 = vpop.f32.mrf.mxu0 }
 0x1b7   :  { %v362_v32 = vpop.f32.mrf.mxu3  ;;  %v386_v33 = vpop.f32.mrf.mxu2 }
 0x1b8   :  { %v363_v34 = vadd.f32 %v362_v32, %v336_v31 }
 0x1ba   :  { %v387_v35 = vadd.f32 %v386_v33, %v363_v34 }
 0x1bf   :  { %v410_v37 = vpop.f32.mrf.mxu3  ;;  %v489_v41 = vpop.f32.mrf.mxu2 }
 0x1c0   :  { %v411_v38 = vadd.f32 %v410_v37, %v387_v35 }
 0x1c2   :  { %v435_v40 = vadd.f32 %v434_v36, %v411_v38 }
 0x1c4   :  { %v457_v42 = vadd.f32 %v456_v39, %v435_v40 }
 0x1c6   :  { %v612_v43 = vsel %vm308_vm1, %v457_v42, -inf }
 0x1c7   :  { %v515_v44 = vpop.f32.mrf.mxu3  ;;  %613 = vmax.xlane.f32.xlu1 %v612_v43  ;;  %v587_v50 = vpop.f32.mrf.mxu2 }
 0x1c8   :  { %v516_v45 = vadd.f32 %v515_v44, %v489_v41  ;;  %v964_v41 = vld [vmem:[#allocation7] sm:$0xff] }
 0x1ca   :  { %v540_v47 = vadd.f32 %v539_v46, %v516_v45  ;;  %v986_v45 = vand.u32 4294901760, %v964_v41 }
 0x1cc   :  { %v564_v49 = vadd.f32 %v563_v48, %v540_v47 }
 0x1ce   :  { %v588_v51 = vadd.f32 %v587_v50, %v564_v49 }
 0x1cf   :  { %v609_v52 = vpop.f32.mrf.mxu3 }
 0x1d0   :  { %v610_v53 = vadd.f32 %v609_v52, %v588_v51  ;;  %v1021_v52 = vsub.f32 %v964_v41, %v986_v45 }
 0x1d2   :  { %v615_v54 = vsel %vm308_vm1, %v610_v53, -inf }
 0x1d3   :  { %616 = vmax.xlane.f32.xlu1 %v615_v54 }
 0x1ec   :  { %812 = vrot.lane.b32.xlu1 %v3971_v62, %s3877_s2 }
 0x23a   :  { %v614_v56 = vpop.xlane.xlu1 %613 }
 0x23b   :  { %v618_v57 = vsub.f32 %v457_v42, %v614_v56  ;;  %v1022_v56 = vand.u32 4294901760, %v1021_v52 }
 0x23d   :  { %v620_v58 = vmul.f32 1.442695, %v618_v57  ;;  %v1023_v57 = vsub.f32 %v1021_v52, %v1022_v56 }
 0x23f   :  { %3737 = vpow2.f32 %v620_v58  ;;  %v1024_v58 = vand.u32 4294901760, %v1023_v57 }
 0x245   :  { %v3738_v59 = vpop.eup %3737 }
 0x246   :  { %v617_v60 = vpop.xlane.xlu1 %616  ;;  %v624_v61 = vsel %vm308_vm1, %v3738_v59, 0.0 }
 0x247   :  { %v619_v63 = vsub.f32 %v610_v53, %v617_v60  ;;  %625 = vadd.xlane.f32.xlu2 %v624_v61 }
 0x249   :  { %v622_v0 = vmul.f32 1.442695, %v619_v63 }
 0x24b   :  { %3739 = vpow2.f32 %v622_v0 }
 0x251   :  { %v3740_v1 = vpop.eup %3739 }
 0x252   :  { %v627_v2 = vsel %vm308_vm1, %v3740_v1, 0.0 }
 0x253   :  { %628 = vadd.xlane.f32.xlu2 %v627_v2 }
 0x25e   :  { %v813_v3 = vpop.permute.xlu1 %812 }
 0x25f   :  { %v833_v4 = vand.u32 4294901760, %v813_v3 }
 0x261   :  { %v860_v5 = vsub.f32 %v813_v3, %v833_v4  ;;  %834 = vmatpush.msrb.mxu2 %v833_v4 }
 0x263   :  { %v861_v6 = vand.u32 4294901760, %v860_v5 }
 0x265   :  { %v862_v7 = vsub.f32 %v860_v5, %v861_v6 }
 0x267   :  { %v863_v8 = vand.u32 4294901760, %v862_v7  ;;  %v1151_v7 = vpop.permute.xlu0 %1150 }
 0x269   :  { %864 = vmatpush.msrb.mxu3 %v863_v8 }
 0x26b   :  { %1152 = vrot.lane.b32.xlu2 %v3968_v55, %s3879_s11 }
 0x2ba   :  { %v626_v9 = vpop.xlane.xlu2 %625 }
 0x2bb   :  { %3741 = vrcp.f32 %v626_v9  ;;  %v641_v13 = vand.u32 2147483648, %v626_v9  ;;  %v639_v15 = vand.u32 2147483647, %v626_v9  ;;  %vm635_vm3 = vweird.f32 %v626_v9 }
 0x2bd   :  { %v642_v18 = vor.u32 1.1754944e-38, %v641_v13  ;;  %vm640_vm5 = vcmp.eq.f32.partialorder %v639_v15, 8.507059e+37 }
 0x2c1   :  { %v3742_v10 = vpop.eup %3741 }
 0x2c2   :  { %v631_v11 = vmul.f32 %v3742_v10, %v626_v9  ;;  %vm636_vm2 = vweird.f32 %v3742_v10 }
 0x2c3   :  { %vm637_vm4 = vmor %vm635_vm3, %vm636_vm2 }
 0x2c4   :  { %v632_v12 = vsub.f32 1.0, %v631_v11 }
 0x2c6   :  { %v633_v14 = vmul.f32 %v3742_v10, %v632_v12  ;;  %v629_v16 = vpop.xlane.xlu2 %628 }
 0x2c7   :  { %3743 = vrcp.f32 %v629_v16  ;;  %v656_v28 = vand.u32 2147483648, %v629_v16  ;;  %v654_v32 = vand.u32 2147483647, %v629_v16  ;;  %vm650_vm7 = vweird.f32 %v629_v16 }
 0x2c8   :  { %v634_v17 = vadd.f32 %v3742_v10, %v633_v14 }
 0x2c9   :  { %v657_v36 = vor.u32 1.1754944e-38, %v656_v28  ;;  %vm655_vm9 = vcmp.eq.f32.partialorder %v654_v32, 8.507059e+37 }
 0x2ca   :  { %v638_v19 = vsel %vm637_vm4, %v3742_v10, %v634_v17 }
 0x2cb   :  { %v643_v20 = vsel %vm640_vm5, %v642_v18, %v638_v19  ;;  %v1154_v19 = vsel %vm308_vm1, %v1151_v7, 0 }
 0x2cc   :  { %v644_v21 = vmul.f32 %v3738_v59, %v643_v20  ;;  %v1307_v20 = vpop.permute.xlu0 %1306 }
 0x2cd   :  { %v3744_v22 = vpop.eup %3743 }
 0x2ce   :  { %v646_v23 = vmul.f32 %v3744_v22, %v629_v16  ;;  %v1153_v24 = vpop.permute.xlu2 %1152  ;;  %v664_v25 = vsel %vm308_vm1, %v644_v21, 0  ;;  %vm651_vm6 = vweird.f32 %v3744_v22 }
 0x2cf   :  { %v683_v26 = vand.u32 4294901760, %v664_v25  ;;  %v1156_v29 = vsel %vm308_vm1, %v1153_v24, 0  ;;  %vm652_vm8 = vmor %vm650_vm7, %vm651_vm6  ;;  %v1310_v24 = vsel %vm308_vm1, %v1307_v20, 0 }
 0x2d0   :  { %v647_v27 = vsub.f32 1.0, %v646_v23  ;;  %v3996_v35 = vand.u32 4294901760, %v1156_v29  ;;  %v1175_v23 = vand.u32 4294901760, %v1154_v19  ;;  %v1327_v28 = vand.u32 4294901760, %v1310_v24 }
 0x2d1   :  { %714 = vmatmul.f32.vlgmr.msra.gmra.mxu1 %v683_v26  ;;  %v684_v30 = vsub.f32 %v664_v25, %v683_v26 }
 0x2d2   :  { %v648_v31 = vmul.f32 %v3744_v22, %v647_v27  ;;  %910 = vmatpush.msra.mxu1 %v833_v4  ;;  %v3999_v42 = vsub.f32 %v1156_v29, %v3996_v35 }
 0x2d3   :  { %738 = vmatmul.f32.vlgmr.msra.gmra.mxu2 %v684_v30  ;;  %v685_v33 = vand.u32 4294901760, %v684_v30 }
 0x2d4   :  { %v649_v34 = vadd.f32 %v3744_v22, %v648_v31  ;;  %936 = vmatpush.msra.mxu2 %v861_v6  ;;  %v1201_v47 = vand.u32 4294901760, %v3999_v42 }
 0x2d5   :  { %762 = vmatmul.f32.vlgmr.msra.gmra.mxu3 %v685_v33  ;;  %v686_v37 = vsub.f32 %v684_v30, %v685_v33  ;;  %v1176_v30 = vsub.f32 %v1154_v19, %v1175_v23  ;;  %v1354_v33 = vsub.f32 %v1310_v24, %v1327_v28 }
 0x2d6   :  { %v653_v38 = vsel %vm652_vm8, %v3744_v22, %v649_v34  ;;  %958 = vmatpush.msra.mxu3 %v833_v4  ;;  %v1202_v50 = vsub.f32 %v3999_v42, %v1201_v47 }
 0x2d7   :  { %v658_v39 = vsel %vm655_vm9, %v657_v36, %v653_v38  ;;  %v687_v40 = vand.u32 4294901760, %v686_v37  ;;  %v1177_v34 = vand.u32 4294901760, %v1176_v30  ;;  %v1305_v36 = vpop.permute.xlu0 %1304  ;;  %v1355_v38 = vand.u32 4294901760, %v1354_v33 }
 0x2d8   :  { %v659_v43 = vmul.f32 %v3740_v1, %v658_v39  ;;  %v1203_v54 = vand.u32 4294901760, %v1202_v50  ;;  %v1308_v41 = vsel %vm308_vm1, %v1305_v36, 0 }
 0x2d9   :  { %688 = vmatmul.f32.vlgmr.msra.gmra.mxu0 %v687_v40  ;;  %808 = vmatmul.f32.vlgmr.msrb.gmra.mxu1 %v683_v26  ;;  %v1178_v39 = vsub.f32 %v1176_v30, %v1177_v34 }
 0x2da   :  { %887 = vmatpush.msra.mxu0 %v860_v5  ;;  %v816_v44 = vsel %vm308_vm1, %v659_v43, 0  ;;  %1025 = vmatpush.msrb.mxu1 %v1024_v58  ;;  %v1356_v43 = vsub.f32 %v1354_v33, %v1355_v38 }
 0x2db   :  { %v835_v46 = vand.u32 4294901760, %v816_v44 }
 0x2dd   :  { %v836_v48 = vsub.f32 %v816_v44, %v835_v46  ;;  %866 = vmatmul.f32.vlgmr.msrb.gmra.mxu3 %v835_v46  ;;  %v1179_v44 = vand.u32 4294901760, %v1178_v39 }
 0x2de   :  { %1080 = vmatpush.msrb.mxu3 %v986_v45 }
 0x2df   :  { %v837_v49 = vand.u32 4294901760, %v836_v48 }
 0x2e1   :  { %786 = vmatmul.f32.vlgmr.msrb.gmra.mxu0 %v683_v26  ;;  %914 = vmatmul.f32.vlgmr.msra.gmra.mxu1 %v837_v49  ;;  %v838_v51 = vsub.f32 %v836_v48, %v837_v49 }
 0x2e2   :  { %987 = vmatpush.msrb.mxu0 %v986_v45  ;;  %1138 = vmatpush.msra.mxu1 %v986_v45  ;;  %v1329_v45 = vand.u32 4294901760, %v1308_v41 }
 0x2e3   :  { %v839_v53 = vand.u32 4294901760, %v838_v51 }
 0x2e5   :  { %840 = vmatmul.f32.vlgmr.msrb.gmra.mxu2 %v839_v53  ;;  %960 = vmatmul.f32.vlgmr.msra.gmra.mxu3 %v835_v46 }
 0x2e6   :  { %1204 = vmatpush.xpose.msra.mxu3 %v1203_v54  ;;  %1052 = vmatpush.msrb.mxu2 %v1021_v52 }
 0x2e9   :  { %890 = vmatmul.f32.vlgmr.msra.gmra.mxu0 %v836_v48 }
 0x2ea   :  { %1112 = vmatpush.msra.mxu0 %v1022_v56 }
 0x2ed   :  { %938 = vmatmul.f32.vlgmr.msra.gmra.mxu2 %v835_v46  ;;  %v1357_v46 = vand.u32 4294901760, %v1356_v43 }
 0x2ee   :  { %1174 = vmatpush.xpose.msra.mxu2 %v3996_v35 }
 0x34e   :  { %v715_v59 = vpop.f32.mrf.mxu1 }
 0x356   :  { %v689_v60 = vpop.f32.mrf.mxu0  ;;  %v739_v63 = vpop.f32.mrf.mxu2 }
 0x357   :  { %v716_v61 = vadd.f32 %v715_v59, %v689_v60  ;;  %v809_v5 = vpop.f32.mrf.mxu1 }
 0x358   :  { %v763_v1 = vpop.f32.mrf.mxu3 }
 0x359   :  { %v740_v0 = vadd.f32 %v739_v63, %v716_v61 }
 0x35b   :  { %v764_v2 = vadd.f32 %v763_v1, %v740_v0 }
 0x35e   :  { %v787_v3 = vpop.f32.mrf.mxu0 }
 0x35f   :  { %v788_v4 = vadd.f32 %v787_v3, %v764_v2  ;;  %v915_v21 = vpop.f32.mrf.mxu1 }
 0x360   :  { %v867_v11 = vpop.f32.mrf.mxu3 }
 0x361   :  { %v810_v6 = vadd.f32 %v809_v5, %v788_v4 }
 0x363   :  { %v966_v8 = vsel %vm308_vm1, %v810_v6, 0 }
 0x364   :  { %v988_v9 = vand.u32 4294901760, %v966_v8 }
 0x366   :  { %v989_v10 = vsub.f32 %v966_v8, %v988_v9  ;;  %1027 = vmatmul.f32.vlgmr.msrb.gmra.mxu1 %v988_v9  ;;  %v891_v15 = vpop.f32.mrf.mxu0 }
 0x367   :  { %1298 = vmatpush.xpose.msrb.mxu1 %v3996_v35 }
 0x368   :  { %v841_v12 = vpop.f32.mrf.mxu2  ;;  %1055 = vmatmul.f32.vlgmr.msrb.gmra.mxu2 %v989_v10  ;;  %v990_v13 = vand.u32 4294901760, %v989_v10  ;;  %v961_v27 = vpop.f32.mrf.mxu3 }
 0x369   :  { %v868_v14 = vadd.f32 %v867_v11, %v841_v12  ;;  %1227 = vmatpush.xpose.msrb.mxu2 %v3999_v42 }
 0x36a   :  { %1084 = vmatmul.f32.vlgmr.msrb.gmra.mxu3 %v990_v13  ;;  %v991_v16 = vsub.f32 %v989_v10, %v990_v13 }
 0x36b   :  { %v892_v17 = vadd.f32 %v891_v15, %v868_v14  ;;  %1250 = vmatpush.xpose.msrb.mxu3 %v3996_v35 }
 0x36c   :  { %v992_v18 = vand.u32 4294901760, %v991_v16 }
 0x36d   :  { %v916_v22 = vadd.f32 %v915_v21, %v892_v17 }
 0x36e   :  { %993 = vmatmul.f32.vlgmr.msrb.gmra.mxu0 %v992_v18 }
 0x36f   :  { %1276 = vmatpush.xpose.msrb.mxu0 %v1201_v47  ;;  %v1330_v47 = vsub.f32 %v1308_v41, %v1329_v45 }
 0x370   :  { %v939_v25 = vpop.f32.mrf.mxu2 }
 0x371   :  { %v940_v26 = vadd.f32 %v939_v25, %v916_v22  ;;  %v1331_v48 = vand.u32 4294901760, %v1330_v47 }
 0x373   :  { %v962_v29 = vadd.f32 %v961_v27, %v940_v26  ;;  %v1332_v49 = vsub.f32 %v1330_v47, %v1331_v48 }
 0x375   :  { %v969_v31 = vsel %vm308_vm1, %v962_v29, 0  ;;  %v1333_v50 = vand.u32 4294901760, %v1332_v49 }
 0x376   :  { %v996_v32 = vand.u32 4294901760, %v969_v31 }
 0x378   :  { %1031 = vmatmul.f32.gmra.mxu1 %v996_v32  ;;  %v997_v35 = vsub.f32 %v969_v31, %v996_v32 }
 0x37a   :  { %1060 = vmatmul.f32.gmra.mxu2 %v997_v35  ;;  %v998_v37 = vand.u32 4294901760, %v997_v35 }
 0x37c   :  { %1090 = vmatmul.f32.gmra.mxu3 %v998_v37  ;;  %v999_v40 = vsub.f32 %v997_v35, %v998_v37 }
 0x37e   :  { %v1000_v42 = vand.u32 4294901760, %v999_v40 }
 0x380   :  { %1001 = vmatmul.f32.gmra.mxu0 %v1000_v42  ;;  %1140 = vmatmul.f32.vlgmr.msra.gmra.mxu1 %v988_v9 }
 0x381   :  { %1404 = vmatpush.xpose.msra.mxu1 %v1327_v28 }
 0x382   :  { %1180 = vmatmul.f32.vlgmr.msra.gmra.mxu2 %v1179_v44 }
 0x383   :  { %1328 = vmatpush.xpose.msra.mxu2 %v1327_v28 }
 0x384   :  { %1206 = vmatmul.f32.vlgmr.msra.gmra.mxu3 %v1175_v23 }
 0x385   :  { %1358 = vmatpush.xpose.msra.mxu3 %v1357_v46 }
 0x388   :  { %1114 = vmatmul.f32.vlgmr.msra.gmra.mxu0 %v988_v9  ;;  %1144 = vmatmul.f32.gmra.mxu1 %v996_v32 }
 0x389   :  { %1381 = vmatpush.xpose.msra.mxu0 %v1354_v33 }
 0x38a   :  { %1230 = vmatmul.f32.vlgmr.msrb.gmra.mxu2 %v1176_v30 }
 0x38b   :  { %1430 = vmatpush.xpose.msrb.mxu2 %v1355_v38 }
 0x38c   :  { %1254 = vmatmul.f32.vlgmr.msrb.gmra.mxu3 %v1177_v34 }
 0x38d   :  { %1452 = vmatpush.xpose.msrb.mxu3 %v1327_v28 }
 0x390   :  { %1118 = vmatmul.f32.gmra.mxu0 %v996_v32  ;;  %1300 = vmatmul.f32.vlgmr.msrb.gmra.mxu1 %v1175_v23 }
 0x392   :  { %1334 = vmatmul.f32.vlgmr.msra.gmra.mxu2 %v1333_v50 }
 0x394   :  { %1360 = vmatmul.f32.vlgmr.msra.gmra.mxu3 %v1329_v45 }
 0x398   :  { %1278 = vmatmul.f32.vlgmr.msrb.gmra.mxu0 %v1175_v23  ;;  %1408 = vmatmul.f32.vlgmr.msra.gmra.mxu1 %v1331_v48 }
 0x39a   :  { %1432 = vmatmul.f32.vlgmr.msrb.gmra.mxu2 %v1329_v45 }
 0x39c   :  { %1454 = vmatmul.f32.vlgmr.msrb.gmra.mxu3 %v1329_v45 }
 0x3a0   :  { %1384 = vmatmul.f32.vlgmr.msra.gmra.mxu0 %v1330_v47 }
 0x3e3   :  { %v4013_v51 = vpop.f32.mrf.mxu1 }
 0x3eb   :  { %v4015_v52 = vpop.f32.mrf.mxu0  ;;  %v4017_v53 = vpop.f32.mrf.mxu2 }
 0x3ed   :  { %v4019_v54 = vpop.f32.mrf.mxu3 }
 0x3f5   :  { %v4021_v56 = vpop.f32.mrf.mxu1 }
 0x3fd   :  { %v4023_v57 = vpop.f32.mrf.mxu0  ;;  %v4025_v58 = vpop.f32.mrf.mxu2 }
 0x3fe   :  { %v4029_v60 = vpop.f32.mrf.mxu1 }
 0x3ff   :  { %v4027_v59 = vpop.f32.mrf.mxu3 }
 0x405   :  { %v4031_v61 = vpop.f32.mrf.mxu0  ;;  %v1181_v63 = vpop.f32.mrf.mxu2 }
 0x406   :  { %v4033_v1 = vpop.f32.mrf.mxu1 }
 0x407   :  { %v1207_v0 = vpop.f32.mrf.mxu3 }
 0x408   :  { %v1208_v4 = vadd.f32 %v1207_v0, %v1181_v63 }
 0x40d   :  { %v4035_v2 = vpop.f32.mrf.mxu0  ;;  %v1231_v3 = vpop.f32.mrf.mxu2 }
 0x40e   :  { %v1232_v6 = vadd.f32 %v1231_v3, %v1208_v4  ;;  %v1301_v8 = vpop.f32.mrf.mxu1 }
 0x40f   :  { %v1255_v5 = vpop.f32.mrf.mxu3 }
 0x410   :  { %v1256_v7 = vadd.f32 %v1255_v5, %v1232_v6 }
 0x415   :  { %v1279_v9 = vpop.f32.mrf.mxu0  ;;  %v1335_v11 = vpop.f32.mrf.mxu2 }
 0x416   :  { %v1280_v10 = vadd.f32 %v1279_v9, %v1256_v7  ;;  %v1409_v18 = vpop.f32.mrf.mxu1 }
 0x417   :  { %v1361_v13 = vpop.f32.mrf.mxu3 }
 0x418   :  { %v1302_v12 = vadd.f32 %v1301_v8, %v1280_v10  ;;  %v1362_v15 = vadd.f32 %v1361_v13, %v1335_v11 }
 0x41a   :  { %v1458_v14 = vsel %vm308_vm1, %v1302_v12, -inf }
 0x41b   :  { %1459 = vmax.xlane.f32.xlu2 %v1458_v14 }
 0x41d   :  { %v1385_v16 = vpop.f32.mrf.mxu0  ;;  %v1433_v20 = vpop.f32.mrf.mxu2 }
 0x41e   :  { %v1386_v17 = vadd.f32 %v1385_v16, %v1362_v15 }
 0x41f   :  { %v1455_v22 = vpop.f32.mrf.mxu3 }
 0x420   :  { %v1410_v19 = vadd.f32 %v1409_v18, %v1386_v17 }
 0x422   :  { %v1434_v21 = vadd.f32 %v1433_v20, %v1410_v19 }
 0x424   :  { %v1456_v23 = vadd.f32 %v1455_v22, %v1434_v21 }
 0x426   :  { %v1461_v24 = vsel %vm308_vm1, %v1456_v23, -inf }
 0x427   :  { %1462 = vmax.xlane.f32.xlu1 %v1461_v24 }
 0x440   :  { %1506 = vrot.lane.b32.xlu1 %v3968_v55, %s3880_s12 }
 0x448   :  { %1996 = vrot.lane.b32.xlu1 %v3968_v55, %s3881_s13 }
 0x48e   :  { %v1460_v25 = vpop.xlane.xlu2 %1459 }
 0x48f   :  { %v1464_v26 = vsub.f32 %v1302_v12, %v1460_v25 }
 0x491   :  { %v1466_v27 = vmul.f32 1.442695, %v1464_v26 }
 0x493   :  { %3745 = vpow2.f32 %v1466_v27 }
 0x499   :  { %v3746_v28 = vpop.eup %3745 }
 0x49a   :  { %v1463_v29 = vpop.xlane.xlu1 %1462  ;;  %v1470_v30 = vsel %vm308_vm1, %v3746_v28, 0.0 }
 0x49b   :  { %v1465_v31 = vsub.f32 %v1456_v23, %v1463_v29  ;;  %1471 = vadd.xlane.f32.xlu0 %v1470_v30 }
 0x49d   :  { %v1468_v32 = vmul.f32 1.442695, %v1465_v31 }
 0x49f   :  { %3747 = vpow2.f32 %v1468_v32 }
 0x4a5   :  { %v4044_v33 = vpop.eup %3747 }
 0x4a6   :  { %v1473_v34 = vsel %vm308_vm1, %v4044_v33, 0.0 }
 0x4a7   :  { %1474 = vadd.xlane.f32.xlu2 %v1473_v34 }
 0x4af   :  { %1998 = vrot.lane.b32.xlu0 %v3968_v55, %s3882_s14 }
 0x4b2   :  { %v1507_v35 = vpop.permute.xlu1 %1506 }
 0x4b3   :  { %v1527_v36 = vand.u32 4294901760, %v1507_v35 }
 0x4b5   :  { %v1554_v37 = vsub.f32 %v1507_v35, %v1527_v36  ;;  %1528 = vmatpush.msrb.mxu0 %v1527_v36  ;;  %1604 = vmatpush.msra.mxu3 %v1527_v36 }
 0x4b7   :  { %v1555_v38 = vand.u32 4294901760, %v1554_v37  ;;  %1581 = vmatpush.msra.mxu2 %v1554_v37  ;;  %2152 = vrot.lane.b32.xlu0 %v3971_v62, %s3882_s14 }
 0x4b9   :  { %v1556_v39 = vsub.f32 %v1554_v37, %v1555_v38  ;;  %1630 = vmatpush.msra.mxu0 %v1555_v38 }
 0x4bb   :  { %v1557_v40 = vand.u32 4294901760, %v1556_v39 }
 0x4bd   :  { %1558 = vmatpush.msrb.mxu1 %v1557_v40 }
 0x4bf   :  { %1652 = vmatpush.msra.mxu1 %v1527_v36  ;;  %1658 = vrot.lane.b32.xlu2 %v3971_v62, %s3880_s12 }
 0x4c7   :  { %2150 = vrot.lane.b32.xlu2 %v3971_v62, %s3881_s13 }
 0x50e   :  { %v1472_v41 = vpop.xlane.xlu0 %1471 }
 0x50f   :  { %3749 = vrcp.f32 %v1472_v41  ;;  %v1487_v45 = vand.u32 2147483648, %v1472_v41  ;;  %v1485_v47 = vand.u32 2147483647, %v1472_v41  ;;  %vm1481_vm11 = vweird.f32 %v1472_v41 }
 0x511   :  { %v1488_v50 = vor.u32 1.1754944e-38, %v1487_v45  ;;  %vm1486_vm13 = vcmp.eq.f32.partialorder %v1485_v47, 8.507059e+37 }
 0x515   :  { %v3750_v42 = vpop.eup %3749 }
 0x516   :  { %v1477_v43 = vmul.f32 %v3750_v42, %v1472_v41  ;;  %vm1482_vm10 = vweird.f32 %v3750_v42 }
 0x517   :  { %vm1483_vm12 = vmor %vm1481_vm11, %vm1482_vm10 }
 0x518   :  { %v1478_v44 = vsub.f32 1.0, %v1477_v43 }
 0x51a   :  { %v1479_v46 = vmul.f32 %v3750_v42, %v1478_v44  ;;  %v1475_v48 = vpop.xlane.xlu2 %1474 }
 0x51b   :  { %3751 = vrcp.f32 %v1475_v48  ;;  %v1502_v12 = vand.u32 2147483648, %v1475_v48  ;;  %v1500_v17 = vand.u32 2147483647, %v1475_v48  ;;  %vm1496_vm15 = vweird.f32 %v1475_v48 }
 0x51c   :  { %v1480_v49 = vadd.f32 %v3750_v42, %v1479_v46 }
 0x51d   :  { %v1503_v22 = vor.u32 1.1754944e-38, %v1502_v12  ;;  %vm1501_vm3 = vcmp.eq.f32.partialorder %v1500_v17, 8.507059e+37 }
 0x51e   :  { %v1484_v63 = vsel %vm1483_vm12, %v3750_v42, %v1480_v49 }
 0x51f   :  { %v1489_v0 = vsel %vm1486_vm13, %v1488_v50, %v1484_v63 }
 0x520   :  { %v1490_v3 = vmul.f32 %v3746_v28, %v1489_v0  ;;  %v1810_v28 = vld [vmem:[#allocation7 + $0x8] sm:$0xff] }
 0x521   :  { %v3752_v4 = vpop.eup %3751  ;;  %v1999_v6 = vpop.permute.xlu0 %1998  ;;  %v1832_v34 = vand.u32 4294901760, %v1810_v28 }
 0x522   :  { %v1492_v5 = vmul.f32 %v3752_v4, %v1475_v48  ;;  %v1659_v7 = vpop.permute.xlu2 %1658  ;;  %v1510_v8 = vsel %vm308_vm1, %v1490_v3, 0  ;;  %v2002_v13 = vsel %vm308_vm1, %v1999_v6, 0  ;;  %vm1497_vm14 = vweird.f32 %v3752_v4 }
 0x523   :  { %v1679_v9 = vand.u32 4294901760, %v1659_v7  ;;  %v1529_v10 = vand.u32 4294901760, %v1510_v8  ;;  %v4056_v21 = vand.u32 4294901760, %v2002_v13  ;;  %vm1498_vm2 = vmor %vm1496_vm15, %vm1497_vm14 }
 0x524   :  { %v1493_v11 = vsub.f32 1.0, %v1492_v5 }
 0x525   :  { %v1706_v14 = vsub.f32 %v1659_v7, %v1679_v9  ;;  %1560 = vmatmul.f32.vlgmr.msrb.gmra.mxu1 %v1529_v10  ;;  %1680 = vmatpush.msrb.mxu2 %v1679_v9  ;;  %v1530_v15 = vsub.f32 %v1510_v8, %v1529_v10  ;;  %v4059_v29 = vsub.f32 %v2002_v13, %v4056_v21 }
 0x526   :  { %v1494_v16 = vmul.f32 %v3752_v4, %v1493_v11  ;;  %1756 = vmatpush.msrb.mxu1 %v1679_v9 }
 0x527   :  { %v1707_v18 = vand.u32 4294901760, %v1706_v14  ;;  %1584 = vmatmul.f32.vlgmr.msra.gmra.mxu2 %v1530_v15  ;;  %v1531_v19 = vand.u32 4294901760, %v1530_v15  ;;  %v2047_v36 = vand.u32 4294901760, %v4059_v29 }
 0x528   :  { %v1495_v20 = vadd.f32 %v3752_v4, %v1494_v16 }
 0x529   :  { %v1708_v23 = vsub.f32 %v1706_v14, %v1707_v18  ;;  %1608 = vmatmul.f32.vlgmr.msra.gmra.mxu3 %v1531_v19  ;;  %1782 = vmatpush.msra.mxu2 %v1707_v18  ;;  %v1532_v24 = vsub.f32 %v1530_v15, %v1531_v19  ;;  %v2048_v39 = vsub.f32 %v4059_v29, %v2047_v36  ;;  %v2153_v19 = vpop.permute.xlu0 %2152 }
 0x52a   :  { %v1499_v25 = vsel %vm1498_vm2, %v3752_v4, %v1495_v20 }
 0x52b   :  { %v1504_v26 = vsel %vm1501_vm3, %v1503_v22, %v1499_v25  ;;  %v1709_v27 = vand.u32 4294901760, %v1708_v23  ;;  %v1533_v30 = vand.u32 4294901760, %v1532_v24  ;;  %v2049_v42 = vand.u32 4294901760, %v2048_v39 }
 0x52c   :  { %v1505_v31 = vmul.f32 %v4044_v33, %v1504_v26  ;;  %v1867_v33 = vsub.f32 %v1810_v28, %v1832_v34  ;;  %v2156_v25 = vsel %vm308_vm1, %v2153_v19, 0 }
 0x52d   :  { %1654 = vmatmul.f32.vlgmr.msra.gmra.mxu1 %v1529_v10  ;;  %1710 = vmatpush.msrb.mxu3 %v1709_v27 }
 0x52e   :  { %1534 = vmatmul.f32.vlgmr.msrb.gmra.mxu0 %v1533_v30  ;;  %v1662_v32 = vsel %vm308_vm1, %v1505_v31, 0  ;;  %v1868_v43 = vand.u32 4294901760, %v1867_v33 }
 0x52f   :  { %1804 = vmatpush.msra.mxu3 %v1679_v9  ;;  %1733 = vmatpush.msrb.mxu0 %v1706_v14  ;;  %v1681_v35 = vand.u32 4294901760, %v1662_v32  ;;  %v1997_v14 = vpop.permute.xlu1 %1996 }
 0x530   :  { %v1869_v44 = vsub.f32 %v1867_v33, %v1868_v43  ;;  %v2000_v18 = vsel %vm308_vm1, %v1997_v14, 0 }
 0x531   :  { %v1682_v37 = vsub.f32 %v1662_v32, %v1681_v35  ;;  %1712 = vmatmul.f32.vlgmr.msrb.gmra.mxu3 %v1681_v35  ;;  %v2021_v24 = vand.u32 4294901760, %v2000_v18 }
 0x532   :  { %1926 = vmatpush.msrb.mxu3 %v1832_v34  ;;  %v1870_v45 = vand.u32 4294901760, %v1869_v44 }
 0x533   :  { %v1683_v38 = vand.u32 4294901760, %v1682_v37  ;;  %v2022_v31 = vsub.f32 %v2000_v18, %v2021_v24 }
 0x534   :  { %1871 = vmatpush.msra.mxu1 %v1870_v45 }
 0x535   :  { %1760 = vmatmul.f32.vlgmr.msrb.gmra.mxu1 %v1683_v38  ;;  %v1684_v40 = vsub.f32 %v1682_v37, %v1683_v38  ;;  %v2151_v38 = vpop.permute.xlu2 %2150 }
 0x536   :  { %1632 = vmatmul.f32.vlgmr.msra.gmra.mxu0 %v1529_v10  ;;  %1984 = vmatpush.msrb.mxu1 %v1832_v34 }
 0x537   :  { %v1685_v41 = vand.u32 4294901760, %v1684_v40  ;;  %1833 = vmatpush.msra.mxu0 %v1832_v34 }
 0x539   :  { %1686 = vmatmul.f32.vlgmr.msrb.gmra.mxu2 %v1685_v41  ;;  %1806 = vmatmul.f32.vlgmr.msra.gmra.mxu3 %v1681_v35  ;;  %v2154_v41 = vsel %vm308_vm1, %v2151_v38, 0 }
 0x53a   :  { %2050 = vmatpush.xpose.msra.mxu3 %v2049_v42  ;;  %1898 = vmatpush.msrb.mxu2 %v1867_v33  ;;  %v2175_v45 = vand.u32 4294901760, %v2154_v41 }
 0x53e   :  { %1736 = vmatmul.f32.vlgmr.msrb.gmra.mxu0 %v1682_v37 }
 0x53f   :  { %1958 = vmatpush.msrb.mxu0 %v1868_v43 }
 0x541   :  { %1784 = vmatmul.f32.vlgmr.msra.gmra.mxu2 %v1681_v35  ;;  %v2023_v35 = vand.u32 4294901760, %v2022_v31 }
 0x542   :  { %2020 = vmatpush.xpose.msra.mxu2 %v4056_v21 }
 0x543   :  { %v2024_v33 = vsub.f32 %v2022_v31, %v2023_v35 }
 0x545   :  { %v2025_v44 = vand.u32 4294901760, %v2024_v33 }
 0x5a2   :  { %v1561_v46 = vpop.f32.mrf.mxu1 }
 0x5aa   :  { %v1585_v49 = vpop.f32.mrf.mxu2  ;;  %v1655_v5 = vpop.f32.mrf.mxu1 }
 0x5ab   :  { %v1535_v47 = vpop.f32.mrf.mxu0 }
 0x5ac   :  { %v1562_v48 = vadd.f32 %v1561_v46, %v1535_v47  ;;  %v1609_v63 = vpop.f32.mrf.mxu3  ;;  %v2176_v47 = vsub.f32 %v2154_v41, %v2175_v45 }
 0x5ae   :  { %v1586_v50 = vadd.f32 %v1585_v49, %v1562_v48  ;;  %v2177_v48 = vand.u32 4294901760, %v2176_v47 }
 0x5b0   :  { %v1610_v0 = vadd.f32 %v1609_v63, %v1586_v50  ;;  %v2178_v49 = vsub.f32 %v2176_v47, %v2177_v48 }
 0x5b2   :  { %v1761_v22 = vpop.f32.mrf.mxu1  ;;  %v2179_v50 = vand.u32 4294901760, %v2178_v49 }
 0x5b3   :  { %v1633_v3 = vpop.f32.mrf.mxu0 }
 0x5b4   :  { %v1634_v4 = vadd.f32 %v1633_v3, %v1610_v0  ;;  %v1713_v10 = vpop.f32.mrf.mxu3 }
 0x5b6   :  { %v1656_v6 = vadd.f32 %v1655_v5, %v1634_v4 }
 0x5b8   :  { %v1812_v7 = vsel %vm308_vm1, %v1656_v6, 0 }
 0x5b9   :  { %v1834_v8 = vand.u32 4294901760, %v1812_v7 }
 0x5bb   :  { %v1835_v9 = vsub.f32 %v1812_v7, %v1834_v8  ;;  %1873 = vmatmul.f32.vlgmr.msra.gmra.mxu1 %v1834_v8  ;;  %v1737_v15 = vpop.f32.mrf.mxu0 }
 0x5bc   :  { %2144 = vmatpush.xpose.msra.mxu1 %v4056_v21  ;;  %v1687_v11 = vpop.f32.mrf.mxu2  ;;  %v1807_v28 = vpop.f32.mrf.mxu3 }
 0x5bd   :  { %v1714_v12 = vadd.f32 %v1713_v10, %v1687_v11  ;;  %1901 = vmatmul.f32.vlgmr.msrb.gmra.mxu2 %v1835_v9  ;;  %v1836_v13 = vand.u32 4294901760, %v1835_v9 }
 0x5be   :  { %2073 = vmatpush.xpose.msrb.mxu2 %v4059_v29  ;;  %v2173_v29 = vand.u32 4294901760, %v2156_v25 }
 0x5bf   :  { %v1738_v16 = vadd.f32 %v1737_v15, %v1714_v12  ;;  %1930 = vmatmul.f32.vlgmr.msrb.gmra.mxu3 %v1836_v13  ;;  %v1837_v17 = vsub.f32 %v1835_v9, %v1836_v13 }
 0x5c0   :  { %2096 = vmatpush.xpose.msrb.mxu3 %v4056_v21  ;;  %v2200_v34 = vsub.f32 %v2156_v25, %v2173_v29 }
 0x5c1   :  { %v1838_v20 = vand.u32 4294901760, %v1837_v17  ;;  %v1762_v23 = vadd.f32 %v1761_v22, %v1738_v16 }
 0x5c2   :  { %v2201_v40 = vand.u32 4294901760, %v2200_v34 }
 0x5c3   :  { %1839 = vmatmul.f32.vlgmr.msra.gmra.mxu0 %v1838_v20 }
 0x5c4   :  { %2122 = vmatpush.xpose.msra.mxu0 %v2047_v36  ;;  %v1785_v26 = vpop.f32.mrf.mxu2  ;;  %v2202_v43 = vsub.f32 %v2200_v34, %v2201_v40 }
 0x5c5   :  { %v1786_v27 = vadd.f32 %v1785_v26, %v1762_v23 }
 0x5c6   :  { %v2203_v46 = vand.u32 4294901760, %v2202_v43 }
 0x5c7   :  { %v1808_v30 = vadd.f32 %v1807_v28, %v1786_v27 }
 0x5c9   :  { %v1815_v32 = vsel %vm308_vm1, %v1808_v30, 0 }
 0x5ca   :  { %v1842_v21 = vand.u32 4294901760, %v1815_v32 }
 0x5cc   :  { %1877 = vmatmul.f32.gmra.mxu1 %v1842_v21  ;;  %v1843_v37 = vsub.f32 %v1815_v32, %v1842_v21 }
 0x5ce   :  { %1906 = vmatmul.f32.gmra.mxu2 %v1843_v37  ;;  %v1844_v39 = vand.u32 4294901760, %v1843_v37 }
 0x5d0   :  { %1936 = vmatmul.f32.gmra.mxu3 %v1844_v39  ;;  %v1845_v36 = vsub.f32 %v1843_v37, %v1844_v39 }
 0x5d2   :  { %v1846_v42 = vand.u32 4294901760, %v1845_v36 }
 0x5d4   :  { %1847 = vmatmul.f32.gmra.mxu0 %v1846_v42  ;;  %1986 = vmatmul.f32.vlgmr.msrb.gmra.mxu1 %v1834_v8 }
 0x5d5   :  { %2250 = vmatpush.xpose.msrb.mxu1 %v2173_v29 }
 0x5d6   :  { %2026 = vmatmul.f32.vlgmr.msra.gmra.mxu2 %v2025_v44 }
 0x5d7   :  { %2174 = vmatpush.xpose.msra.mxu2 %v2173_v29 }
 0x5d8   :  { %2052 = vmatmul.f32.vlgmr.msra.gmra.mxu3 %v2021_v24 }
 0x5d9   :  { %2204 = vmatpush.xpose.msra.mxu3 %v2203_v46 }
 0x5dc   :  { %1960 = vmatmul.f32.vlgmr.msrb.gmra.mxu0 %v1834_v8  ;;  %1990 = vmatmul.f32.gmra.mxu1 %v1842_v21 }
 0x5dd   :  { %2227 = vmatpush.xpose.msrb.mxu0 %v2200_v34 }
 0x5de   :  { %2076 = vmatmul.f32.vlgmr.msrb.gmra.mxu2 %v2022_v31 }
 0x5df   :  { %2276 = vmatpush.xpose.msrb.mxu2 %v2201_v40 }
 0x5e0   :  { %2100 = vmatmul.f32.vlgmr.msrb.gmra.mxu3 %v2023_v35 }
 0x5e1   :  { %2298 = vmatpush.xpose.msrb.mxu3 %v2173_v29 }
 0x5e4   :  { %1964 = vmatmul.f32.gmra.mxu0 %v1842_v21  ;;  %2146 = vmatmul.f32.vlgmr.msra.gmra.mxu1 %v2021_v24 }
 0x5e6   :  { %2180 = vmatmul.f32.vlgmr.msra.gmra.mxu2 %v2179_v50 }
 0x5e8   :  { %2206 = vmatmul.f32.vlgmr.msra.gmra.mxu3 %v2175_v45 }
 0x5ec   :  { %2124 = vmatmul.f32.vlgmr.msra.gmra.mxu0 %v2021_v24  ;;  %2254 = vmatmul.f32.vlgmr.msrb.gmra.mxu1 %v2177_v48 }
 0x5ee   :  { %2278 = vmatmul.f32.vlgmr.msrb.gmra.mxu2 %v2175_v45 }
 0x5f0   :  { %2300 = vmatmul.f32.vlgmr.msrb.gmra.mxu3 %v2175_v45 }
 0x5f4   :  { %2230 = vmatmul.f32.vlgmr.msrb.gmra.mxu0 %v2176_v47 }
 0x638   :  { %v1874_v63 = vpop.f32.mrf.mxu1 }
 0x640   :  { %v1840_v0 = vpop.f32.mrf.mxu0  ;;  %v1902_v4 = vpop.f32.mrf.mxu2 }
 0x641   :  { %v1875_v3 = vadd.f32 %v1874_v63, %v1840_v0 }
 0x642   :  { %v1931_v6 = vpop.f32.mrf.mxu3 }
 0x643   :  { %v1903_v5 = vadd.f32 %v1902_v4, %v1875_v3 }
 0x645   :  { %v1932_v7 = vadd.f32 %v1931_v6, %v1903_v5 }
 0x649   :  { %v1878_v8 = vpop.f32.mrf.mxu1 }
 0x651   :  { %v1848_v9 = vpop.f32.mrf.mxu0  ;;  %v1907_v10 = vpop.f32.mrf.mxu2 }
 0x652   :  { %v1879_v11 = vadd.f32 %v1878_v8, %v1848_v9  ;;  %v1987_v14 = vpop.f32.mrf.mxu1 }
 0x653   :  { %v1937_v12 = vpop.f32.mrf.mxu3 }
 0x654   :  { %v1908_v13 = vadd.f32 %v1907_v10, %v1879_v11 }
 0x656   :  { %v1938_v15 = vadd.f32 %v1937_v12, %v1908_v13 }
 0x659   :  { %v1961_v16 = vpop.f32.mrf.mxu0  ;;  %v2027_v17 = vpop.f32.mrf.mxu2 }
 0x65a   :  { %v1962_v18 = vadd.f32 %v1961_v16, %v1932_v7  ;;  %v1991_v22 = vpop.f32.mrf.mxu1 }
 0x65b   :  { %v2053_v19 = vpop.f32.mrf.mxu3 }
 0x65c   :  { %v4074_v20 = vadd.f32 %v1987_v14, %v1962_v18  ;;  %v2054_v25 = vadd.f32 %v2053_v19, %v2027_v17 }
 0x661   :  { %v1965_v23 = vpop.f32.mrf.mxu0  ;;  %v2077_v24 = vpop.f32.mrf.mxu2 }
 0x662   :  { %v1966_v26 = vadd.f32 %v1965_v23, %v1938_v15  ;;  %v2078_v29 = vadd.f32 %v2077_v24, %v2054_v25  ;;  %v2147_v31 = vpop.f32.mrf.mxu1 }
 0x663   :  { %v2101_v27 = vpop.f32.mrf.mxu3 }
 0x664   :  { %v4076_v28 = vadd.f32 %v1991_v22, %v1966_v26  ;;  %v2102_v30 = vadd.f32 %v2101_v27, %v2078_v29 }
 0x669   :  { %v2125_v32 = vpop.f32.mrf.mxu0  ;;  %v2181_v34 = vpop.f32.mrf.mxu2 }
 0x66a   :  { %v2126_v21 = vadd.f32 %v2125_v32, %v2102_v30  ;;  %v2255_v36 = vpop.f32.mrf.mxu1 }
 0x66b   :  { %v2207_v37 = vpop.f32.mrf.mxu3 }
 0x66c   :  { %v2148_v35 = vadd.f32 %v2147_v31, %v2126_v21  ;;  %v2208_v39 = vadd.f32 %v2207_v37, %v2181_v34 }
 0x66e   :  { %v2304_v38 = vsel %vm308_vm1, %v2148_v35, -inf }
 0x66f   :  { %2305 = vmax.xlane.f32.xlu1 %v2304_v38 }
 0x671   :  { %v2231_v40 = vpop.f32.mrf.mxu0  ;;  %v2279_v42 = vpop.f32.mrf.mxu2 }
 0x672   :  { %v2232_v33 = vadd.f32 %v2231_v40, %v2208_v39 }
 0x673   :  { %v2301_v44 = vpop.f32.mrf.mxu3 }
 0x674   :  { %v2256_v41 = vadd.f32 %v2255_v36, %v2232_v33 }
 0x676   :  { %v2280_v43 = vadd.f32 %v2279_v42, %v2256_v41 }
 0x678   :  { %v2302_v45 = vadd.f32 %v2301_v44, %v2280_v43 }
 0x67a   :  { %v2307_v46 = vsel %vm308_vm1, %v2302_v45, -inf }
 0x67b   :  { %2308 = vmax.xlane.f32.xlu0 %v2307_v46 }
 0x68f   :  { %2352 = vrot.lane.b32.xlu0 %v3968_v55, %s3883_s15 }
 0x697   :  { %2842 = vrot.lane.b32.xlu0 %v3968_v55, %s3884_s16 }
 0x69f   :  { %2996 = vrot.lane.b32.xlu0 %v3971_v62, %s3884_s16 }
 0x6e2   :  { %v2306_v47 = vpop.xlane.xlu1 %2305 }
 0x6e3   :  { %v2310_v48 = vsub.f32 %v2148_v35, %v2306_v47 }
 0x6e5   :  { %v2312_v49 = vmul.f32 1.442695, %v2310_v48 }
 0x6e7   :  { %3753 = vpow2.f32 %v2312_v49 }
 0x6ed   :  { %v3754_v50 = vpop.eup %3753 }
 0x6ee   :  { %v2309_v63 = vpop.xlane.xlu0 %2308  ;;  %v2316_v0 = vsel %vm308_vm1, %v3754_v50, 0.0 }
 0x6ef   :  { %v2311_v3 = vsub.f32 %v2302_v45, %v2309_v63  ;;  %2317 = vadd.xlane.f32.xlu2 %v2316_v0 }
 0x6f1   :  { %v2314_v4 = vmul.f32 1.442695, %v2311_v3 }
 0x6f3   :  { %3755 = vpow2.f32 %v2314_v4 }
 0x6f9   :  { %v4084_v5 = vpop.eup %3755 }
 0x6fa   :  { %v2319_v6 = vsel %vm308_vm1, %v4084_v5, 0.0 }
 0x6fb   :  { %2320 = vadd.xlane.f32.xlu1 %v2319_v6 }
 0x701   :  { %v2353_v7 = vpop.permute.xlu0 %2352 }
 0x702   :  { %v2373_v8 = vand.u32 4294901760, %v2353_v7 }
 0x704   :  { %v2400_v9 = vsub.f32 %v2353_v7, %v2373_v8  ;;  %2374 = vmatpush.msra.mxu0 %v2373_v8  ;;  %2450 = vmatpush.msra.mxu3 %v2373_v8 }
 0x706   :  { %v2401_v10 = vand.u32 4294901760, %v2400_v9  ;;  %2427 = vmatpush.msra.mxu2 %v2400_v9 }
 0x707   :  { %2504 = vrot.lane.b32.xlu2 %v3971_v62, %s3883_s15 }
 0x708   :  { %v2402_v11 = vsub.f32 %v2400_v9, %v2401_v10  ;;  %2476 = vmatpush.msrb.mxu0 %v2401_v10 }
 0x70a   :  { %v2403_v12 = vand.u32 4294901760, %v2402_v11 }
 0x70c   :  { %2404 = vmatpush.msra.mxu1 %v2403_v12 }
 0x70e   :  { %2498 = vmatpush.msrb.mxu1 %v2373_v8 }
 0x70f   :  { %2998 = vrot.lane.b32.xlu2 %v3971_v62, %s3885_s17 }
 0x714   :  { %2844 = vrot.lane.b32.xlu1 %v3968_v55, %s3885_s17 }
 0x762   :  { %v2318_v13 = vpop.xlane.xlu2 %2317 }
 0x763   :  { %3757 = vrcp.f32 %v2318_v13  ;;  %v2333_v19 = vand.u32 2147483648, %v2318_v13  ;;  %v2331_v24 = vand.u32 2147483647, %v2318_v13  ;;  %vm2327_vm5 = vweird.f32 %v2318_v13 }
 0x765   :  { %v2334_v29 = vor.u32 1.1754944e-38, %v2333_v19  ;;  %vm2332_vm7 = vcmp.eq.f32.partialorder %v2331_v24, 8.507059e+37 }
 0x769   :  { %v3758_v14 = vpop.eup %3757 }
 0x76a   :  { %v2323_v15 = vmul.f32 %v3758_v14, %v2318_v13  ;;  %v2505_v16 = vpop.permute.xlu2 %2504  ;;  %vm2328_vm4 = vweird.f32 %v3758_v14 }
 0x76b   :  { %v2525_v17 = vand.u32 4294901760, %v2505_v16  ;;  %vm2329_vm6 = vmor %vm2327_vm5, %vm2328_vm4 }
 0x76c   :  { %v2324_v18 = vsub.f32 1.0, %v2323_v15 }
 0x76d   :  { %v2552_v22 = vsub.f32 %v2505_v16, %v2525_v17  ;;  %2526 = vmatpush.msrb.mxu2 %v2525_v17 }
 0x76e   :  { %v2325_v23 = vmul.f32 %v3758_v14, %v2324_v18  ;;  %v2321_v25 = vpop.xlane.xlu1 %2320 }
 0x76f   :  { %v2553_v26 = vand.u32 4294901760, %v2552_v22  ;;  %3759 = vrcp.f32 %v2321_v25  ;;  %v2348_v33 = vand.u32 2147483648, %v2321_v25  ;;  %v2346_v42 = vand.u32 2147483647, %v2321_v25 }
 0x770   :  { %v2326_v27 = vadd.f32 %v3758_v14, %v2325_v23  ;;  %vm2342_vm9 = vweird.f32 %v2321_v25 }
 0x771   :  { %v2554_v30 = vsub.f32 %v2552_v22, %v2553_v26  ;;  %v2349_v45 = vor.u32 1.1754944e-38, %v2348_v33  ;;  %vm2347_vm11 = vcmp.eq.f32.partialorder %v2346_v42, 8.507059e+37 }
 0x772   :  { %v2330_v31 = vsel %vm2329_vm6, %v3758_v14, %v2326_v27 }
 0x773   :  { %v2335_v32 = vsel %vm2332_vm7, %v2334_v29, %v2330_v31  ;;  %v2555_v21 = vand.u32 4294901760, %v2554_v30 }
 0x774   :  { %v2336_v34 = vmul.f32 %v3754_v50, %v2335_v32  ;;  %v2656_v50 = vld [vmem:[#allocation7 + $0x10] sm:$0xff] }
 0x775   :  { %v3760_v35 = vpop.eup %3759  ;;  %2556 = vmatpush.msrb.mxu3 %v2555_v21  ;;  %v2678_v3 = vand.u32 4294901760, %v2656_v50 }
 0x776   :  { %v2338_v37 = vmul.f32 %v3760_v35, %v2321_v25  ;;  %v2356_v38 = vsel %vm308_vm1, %v2336_v34, 0  ;;  %vm2343_vm8 = vweird.f32 %v3760_v35 }
 0x777   :  { %v2375_v39 = vand.u32 4294901760, %v2356_v38  ;;  %vm2344_vm10 = vmor %vm2342_vm9, %vm2343_vm8 }
 0x778   :  { %v2339_v40 = vsub.f32 1.0, %v2338_v37 }
 0x779   :  { %v2376_v36 = vsub.f32 %v2356_v38, %v2375_v39  ;;  %2406 = vmatmul.f32.vlgmr.msra.gmra.mxu1 %v2375_v39 }
 0x77a   :  { %v2340_v41 = vmul.f32 %v3760_v35, %v2339_v40  ;;  %2602 = vmatpush.msra.mxu1 %v2525_v17 }
 0x77b   :  { %2430 = vmatmul.f32.vlgmr.msra.gmra.mxu2 %v2376_v36  ;;  %v2377_v43 = vand.u32 4294901760, %v2376_v36 }
 0x77c   :  { %v2341_v44 = vadd.f32 %v3760_v35, %v2340_v41  ;;  %2628 = vmatpush.msra.mxu2 %v2553_v26 }
 0x77d   :  { %2454 = vmatmul.f32.vlgmr.msra.gmra.mxu3 %v2377_v43  ;;  %v2378_v46 = vsub.f32 %v2376_v36, %v2377_v43  ;;  %v2843_v36 = vpop.permute.xlu0 %2842 }
 0x77e   :  { %v2345_v47 = vsel %vm2344_vm10, %v3760_v35, %v2341_v44  ;;  %2650 = vmatpush.msra.mxu3 %v2525_v17 }
 0x77f   :  { %v2350_v48 = vsel %vm2347_vm11, %v2349_v45, %v2345_v47  ;;  %v2379_v49 = vand.u32 4294901760, %v2378_v46  ;;  %v2846_v45 = vsel %vm308_vm1, %v2843_v36, 0  ;;  %v2999_v46 = vpop.permute.xlu2 %2998  ;;  %v1033_v36 = vadd.f32 %v4021_v56, %v4023_v57 }
 0x780   :  { %v2351_v63 = vmul.f32 %v4084_v5, %v2350_v48  ;;  %v2713_v5 = vsub.f32 %v2656_v50, %v2678_v3  ;;  %v3002_v50 = vsel %vm308_vm1, %v2999_v46, 0 }
 0x781   :  { %2380 = vmatmul.f32.vlgmr.msra.gmra.mxu0 %v2379_v49  ;;  %2500 = vmatmul.f32.vlgmr.msrb.gmra.mxu1 %v2375_v39  ;;  %v2867_v49 = vand.u32 4294901760, %v2846_v45  ;;  %v1062_v46 = vadd.f32 %v4025_v58, %v1033_v36 }
 0x782   :  { %2579 = vmatpush.msra.mxu0 %v2552_v22  ;;  %v2508_v0 = vsel %vm308_vm1, %v2351_v63, 0  ;;  %v2714_v17 = vand.u32 4294901760, %v2713_v5 }
 0x783   :  { %v2527_v4 = vand.u32 4294901760, %v2508_v0 }
 0x784   :  { %v2715_v18 = vsub.f32 %v2713_v5, %v2714_v17 }
 0x785   :  { %v2528_v6 = vsub.f32 %v2508_v0, %v2527_v4  ;;  %2558 = vmatmul.f32.vlgmr.msrb.gmra.mxu3 %v2527_v4 }
 0x786   :  { %v2845_v7 = vpop.permute.xlu1 %2844  ;;  %2772 = vmatpush.msrb.mxu3 %v2678_v3  ;;  %v2716_v19 = vand.u32 4294901760, %v2715_v18 }
 0x787   :  { %v2848_v8 = vsel %vm308_vm1, %v2845_v7, 0  ;;  %v2529_v9 = vand.u32 4294901760, %v2528_v6  ;;  %v2868_v7 = vsub.f32 %v2846_v45, %v2867_v49 }
 0x788   :  { %v2865_v10 = vand.u32 4294901760, %v2848_v8  ;;  %2717 = vmatpush.msrb.mxu1 %v2716_v19 }
 0x789   :  { %2478 = vmatmul.f32.vlgmr.msrb.gmra.mxu0 %v2375_v39  ;;  %2606 = vmatmul.f32.vlgmr.msra.gmra.mxu1 %v2529_v9  ;;  %v2530_v11 = vsub.f32 %v2528_v6, %v2529_v9 }
 0x78a   :  { %v2892_v12 = vsub.f32 %v2848_v8, %v2865_v10  ;;  %2679 = vmatpush.msrb.mxu0 %v2678_v3  ;;  %2830 = vmatpush.msra.mxu1 %v2678_v3 }
 0x78b   :  { %v2531_v13 = vand.u32 4294901760, %v2530_v11  ;;  %v2869_v11 = vand.u32 4294901760, %v2868_v7 }
 0x78c   :  { %v2893_v14 = vand.u32 4294901760, %v2892_v12 }
 0x78d   :  { %2532 = vmatmul.f32.vlgmr.msrb.gmra.mxu2 %v2531_v13  ;;  %2652 = vmatmul.f32.vlgmr.msra.gmra.mxu3 %v2527_v4 }
 0x78e   :  { %v2894_v15 = vsub.f32 %v2892_v12, %v2893_v14  ;;  %2744 = vmatpush.msrb.mxu2 %v2713_v5  ;;  %v2997_v5 = vpop.permute.xlu0 %2996 }
 0x790   :  { %v2895_v16 = vand.u32 4294901760, %v2894_v15  ;;  %v2870_v15 = vsub.f32 %v2868_v7, %v2869_v11 }
 0x791   :  { %2582 = vmatmul.f32.vlgmr.msra.gmra.mxu0 %v2528_v6 }
 0x792   :  { %2896 = vmatpush.xpose.msra.mxu3 %v2895_v16  ;;  %2804 = vmatpush.msra.mxu0 %v2714_v17  ;;  %v3000_v17 = vsel %vm308_vm1, %v2997_v5, 0 }
 0x795   :  { %2630 = vmatmul.f32.vlgmr.msra.gmra.mxu2 %v2527_v4  ;;  %v3019_v4 = vand.u32 4294901760, %v3002_v50 }
 0x796   :  { %2866 = vmatpush.xpose.msra.mxu2 %v2865_v10 }
 0x7f6   :  { %v2407_v22 = vpop.f32.mrf.mxu1 }
 0x7fe   :  { %v2381_v23 = vpop.f32.mrf.mxu0  ;;  %v2431_v25 = vpop.f32.mrf.mxu2 }
 0x7ff   :  { %v2408_v24 = vadd.f32 %v2407_v22, %v2381_v23  ;;  %v2501_v32 = vpop.f32.mrf.mxu1  ;;  %v2871_v22 = vand.u32 4294901760, %v2870_v15  ;;  %v3021_v23 = vand.u32 4294901760, %v3000_v17 }
 0x800   :  { %v2455_v27 = vpop.f32.mrf.mxu3 }
 0x801   :  { %v2432_v26 = vadd.f32 %v2431_v25, %v2408_v24  ;;  %v3022_v25 = vsub.f32 %v3000_v17, %v3021_v23 }
 0x803   :  { %v2456_v29 = vadd.f32 %v2455_v27, %v2432_v26  ;;  %v3023_v26 = vand.u32 4294901760, %v3022_v25 }
 0x805   :  { %v3024_v27 = vsub.f32 %v3022_v25, %v3023_v26 }
 0x806   :  { %v2479_v30 = vpop.f32.mrf.mxu0 }
 0x807   :  { %v2480_v31 = vadd.f32 %v2479_v30, %v2456_v29  ;;  %v2607_v47 = vpop.f32.mrf.mxu1  ;;  %v3025_v29 = vand.u32 4294901760, %v3024_v27 }
 0x808   :  { %v2559_v39 = vpop.f32.mrf.mxu3 }
 0x809   :  { %v2502_v21 = vadd.f32 %v2501_v32, %v2480_v31 }
 0x80b   :  { %v2658_v34 = vsel %vm308_vm1, %v2502_v21, 0 }
 0x80c   :  { %v2680_v35 = vand.u32 4294901760, %v2658_v34 }
 0x80e   :  { %v2681_v37 = vsub.f32 %v2658_v34, %v2680_v35  ;;  %2719 = vmatmul.f32.vlgmr.msrb.gmra.mxu1 %v2680_v35  ;;  %v2583_v42 = vpop.f32.mrf.mxu0 }
 0x80f   :  { %2990 = vmatpush.xpose.msrb.mxu1 %v2865_v10 }
 0x810   :  { %v2682_v38 = vand.u32 4294901760, %v2681_v37  ;;  %v2533_v40 = vpop.f32.mrf.mxu2  ;;  %2747 = vmatmul.f32.vlgmr.msrb.gmra.mxu2 %v2681_v37  ;;  %v2653_v3 = vpop.f32.mrf.mxu3 }
 0x811   :  { %v2560_v33 = vadd.f32 %v2559_v39, %v2533_v40  ;;  %2919 = vmatpush.xpose.msrb.mxu2 %v2892_v12 }
 0x812   :  { %v2683_v41 = vsub.f32 %v2681_v37, %v2682_v38  ;;  %2776 = vmatmul.f32.vlgmr.msrb.gmra.mxu3 %v2682_v38  ;;  %v1029_v38 = vadd.f32 %v4013_v51, %v4015_v52  ;;  %v3736_v51 = vld [vmem:[%s4149_s4] ss:$0 sm:$0xff]  ;;  %s3886_s4 = smov 40  }
 0x813   :  { %v2584_v43 = vadd.f32 %v2583_v42, %v2560_v33  ;;  %2942 = vmatpush.xpose.msrb.mxu3 %v2865_v10  ;;  %v3046_v10 = vsub.f32 %v3002_v50, %v3019_v4 }
 0x814   :  { %v2684_v44 = vand.u32 4294901760, %v2683_v41  ;;  %v1057_v40 = vadd.f32 %v4017_v53, %v1029_v38 }
 0x815   :  { %v2608_v48 = vadd.f32 %v2607_v47, %v2584_v43 }
 0x816   :  { %2685 = vmatmul.f32.vlgmr.msrb.gmra.mxu0 %v2684_v44  ;;  %v1086_v33 = vadd.f32 %v4019_v54, %v1057_v40  ;;  %v1092_v54 = vadd.f32 %v4027_v59, %v1062_v46 }
 0x817   :  { %2968 = vmatpush.xpose.msrb.mxu0 %v2893_v14  ;;  %v3047_v14 = vand.u32 4294901760, %v3046_v10 }
 0x818   :  { %v2631_v63 = vpop.f32.mrf.mxu2  ;;  %v1116_v43 = vadd.f32 %v4031_v61, %v1086_v33  ;;  %v1120_v61 = vadd.f32 %v4035_v2, %v1092_v54 }
 0x819   :  { %v2632_v0 = vadd.f32 %v2631_v63, %v2608_v48  ;;  %v3048_v19 = vsub.f32 %v3046_v10, %v3047_v14 }
 0x81a   :  { %v1142_v52 = vadd.f32 %v4029_v60, %v1116_v43 }
 0x81b   :  { %v2654_v6 = vadd.f32 %v2653_v3, %v2632_v0  ;;  %v3049_v24 = vand.u32 4294901760, %v3048_v19  ;;  %v1146_v3 = vadd.f32 %v4033_v1, %v1120_v61 }
 0x81d   :  { %v2661_v8 = vsel %vm308_vm1, %v2654_v6, 0 }
 0x81e   :  { %v2688_v9 = vand.u32 4294901760, %v2661_v8 }
 0x820   :  { %2723 = vmatmul.f32.gmra.mxu1 %v2688_v9  ;;  %v2689_v12 = vsub.f32 %v2661_v8, %v2688_v9  ;;  %v1149_v8 = vadd.f32 %v3736_v51, %v1146_v3 }
 0x822   :  { %2752 = vmatmul.f32.gmra.mxu2 %v2689_v12  ;;  %v2690_v13 = vand.u32 4294901760, %v2689_v12 }
 0x824   :  { %2782 = vmatmul.f32.gmra.mxu3 %v2690_v13  ;;  %v2691_v16 = vsub.f32 %v2689_v12, %v2690_v13 }
 0x826   :  { %v2692_v18 = vand.u32 4294901760, %v2691_v16 }
 0x828   :  { %2693 = vmatmul.f32.gmra.mxu0 %v2692_v18  ;;  %2832 = vmatmul.f32.vlgmr.msra.gmra.mxu1 %v2680_v35 }
 0x829   :  { %3096 = vmatpush.xpose.msra.mxu1 %v3019_v4 }
 0x82a   :  { %2872 = vmatmul.f32.vlgmr.msra.gmra.mxu2 %v2871_v22 }
 0x82b   :  { %3020 = vmatpush.xpose.msra.mxu2 %v3019_v4 }
 0x82c   :  { %2898 = vmatmul.f32.vlgmr.msra.gmra.mxu3 %v2867_v49 }
 0x82d   :  { %3050 = vmatpush.xpose.msra.mxu3 %v3049_v24 }
 0x830   :  { %2806 = vmatmul.f32.vlgmr.msra.gmra.mxu0 %v2680_v35  ;;  %2836 = vmatmul.f32.gmra.mxu1 %v2688_v9 }
 0x831   :  { %3073 = vmatpush.xpose.msra.mxu0 %v3046_v10 }
 0x832   :  { %2922 = vmatmul.f32.vlgmr.msrb.gmra.mxu2 %v2868_v7 }
 0x833   :  { %3122 = vmatpush.xpose.msrb.mxu2 %v3047_v14 }
 0x834   :  { %2946 = vmatmul.f32.vlgmr.msrb.gmra.mxu3 %v2869_v11  ;;  %v1995_v11 = vadd.f32 %v4076_v28, %v1149_v8 }
 0x835   :  { %3144 = vmatpush.xpose.msrb.mxu3 %v3019_v4 }
 0x838   :  { %2810 = vmatmul.f32.gmra.mxu0 %v2688_v9  ;;  %2992 = vmatmul.f32.vlgmr.msrb.gmra.mxu1 %v2867_v49 }
 0x83a   :  { %3026 = vmatmul.f32.vlgmr.msra.gmra.mxu2 %v3025_v29 }
 0x83c   :  { %3052 = vmatmul.f32.vlgmr.msra.gmra.mxu3 %v3021_v23 }
 0x840   :  { %2970 = vmatmul.f32.vlgmr.msrb.gmra.mxu0 %v2867_v49  ;;  %3100 = vmatmul.f32.vlgmr.msra.gmra.mxu1 %v3023_v26  ;;  %v1148_v49 = vadd.f32 %v3736_v51, %v1142_v52 }
 0x842   :  { %3124 = vmatmul.f32.vlgmr.msrb.gmra.mxu2 %v3021_v23  ;;  %v1994_v58 = vadd.f32 %v4074_v20, %v1148_v49 }
 0x844   :  { %3146 = vmatmul.f32.vlgmr.msrb.gmra.mxu3 %v3021_v23 }
 0x848   :  { %3076 = vmatmul.f32.vlgmr.msra.gmra.mxu0 %v3022_v25 }
 0x88b   :  { %v2720_v30 = vpop.f32.mrf.mxu1 }
 0x893   :  { %v2686_v31 = vpop.f32.mrf.mxu0  ;;  %v2748_v21 = vpop.f32.mrf.mxu2 }
 0x894   :  { %v2721_v32 = vadd.f32 %v2720_v30, %v2686_v31 }
 0x895   :  { %v2777_v35 = vpop.f32.mrf.mxu3 }
 0x896   :  { %v2749_v34 = vadd.f32 %v2748_v21, %v2721_v32 }
 0x898   :  { %v2778_v37 = vadd.f32 %v2777_v35, %v2749_v34 }
 0x89d   :  { %v2724_v39 = vpop.f32.mrf.mxu1 }
 0x8a5   :  { %v2694_v41 = vpop.f32.mrf.mxu0  ;;  %v2753_v42 = vpop.f32.mrf.mxu2 }
 0x8a6   :  { %v2725_v44 = vadd.f32 %v2724_v39, %v2694_v41  ;;  %v2833_v48 = vpop.f32.mrf.mxu1 }
 0x8a7   :  { %v2783_v45 = vpop.f32.mrf.mxu3 }
 0x8a8   :  { %v2754_v47 = vadd.f32 %v2753_v42, %v2725_v44 }
 0x8aa   :  { %v2784_v53 = vadd.f32 %v2783_v45, %v2754_v47 }
 0x8ad   :  { %v2807_v56 = vpop.f32.mrf.mxu0  ;;  %v2873_v57 = vpop.f32.mrf.mxu2 }
 0x8ae   :  { %v2808_v50 = vadd.f32 %v2807_v56, %v2778_v37  ;;  %v2837_v6 = vpop.f32.mrf.mxu1 }
 0x8af   :  { %v2899_v63 = vpop.f32.mrf.mxu3 }
 0x8b0   :  { %v2834_v0 = vadd.f32 %v2833_v48, %v2808_v50  ;;  %v2900_v9 = vadd.f32 %v2899_v63, %v2873_v57 }
 0x8b2   :  { %v4116_v4 = vadd.f32 %v2834_v0, %v1994_v58 }
 0x8b5   :  { %v2811_v7 = vpop.f32.mrf.mxu0  ;;  %v2923_v60 = vpop.f32.mrf.mxu2 }
 0x8b6   :  { %v2812_v59 = vadd.f32 %v2811_v7, %v2784_v53  ;;  %v2924_v2 = vadd.f32 %v2923_v60, %v2900_v9  ;;  %v2993_v20 = vpop.f32.mrf.mxu1 }
 0x8b7   :  { %v2947_v10 = vpop.f32.mrf.mxu3 }
 0x8b8   :  { %v2838_v12 = vadd.f32 %v2837_v6, %v2812_v59  ;;  %v2948_v13 = vadd.f32 %v2947_v10, %v2924_v2 }
 0x8ba   :  { %v4119_v5 = vadd.f32 %v2838_v12, %v1995_v11 }
 0x8bd   :  { %v2971_v14 = vpop.f32.mrf.mxu0  ;;  %v3027_v1 = vpop.f32.mrf.mxu2 }
 0x8be   :  { %v2972_v15 = vadd.f32 %v2971_v14, %v2948_v13  ;;  %v3101_v24 = vpop.f32.mrf.mxu1 }
 0x8bf   :  { %v3053_v17 = vpop.f32.mrf.mxu3 }
 0x8c0   :  { %v2994_v16 = vadd.f32 %v2993_v20, %v2972_v15  ;;  %v3054_v19 = vadd.f32 %v3053_v17, %v3027_v1 }
 0x8c2   :  { %v3150_v18 = vsel %vm308_vm1, %v2994_v16, -inf }
 0x8c3   :  { %3151 = vmax.xlane.f32.xlu1 %v3150_v18 }
 0x8c5   :  { %v3077_v22 = vpop.f32.mrf.mxu0  ;;  %v3125_v28 = vpop.f32.mrf.mxu2 }
 0x8c6   :  { %v3078_v23 = vadd.f32 %v3077_v22, %v3054_v19 }
 0x8c7   :  { %v3147_v27 = vpop.f32.mrf.mxu3 }
 0x8c8   :  { %v3102_v25 = vadd.f32 %v3101_v24, %v3078_v23 }
 0x8ca   :  { %v3126_v26 = vadd.f32 %v3125_v28, %v3102_v25 }
 0x8cc   :  { %v3148_v29 = vadd.f32 %v3147_v27, %v3126_v26  ;;  %v3502_v26 = vld [vmem:[#allocation7 + $0x18] sm:$0xff] }
 0x8cd   :  { %v3524_v27 = vand.u32 4294901760, %v3502_v26 }
 0x8ce   :  { %v3153_v30 = vsel %vm308_vm1, %v3148_v29, -inf }
 0x8cf   :  { %3154 = vmax.xlane.f32.xlu2 %v3153_v30 }
 0x8e7   :  { %3198 = vrot.lane.b32.xlu2 %v3968_v55, %s3886_s4 }
 0x936   :  { %v3152_v31 = vpop.xlane.xlu1 %3151 }
 0x937   :  { %v3156_v32 = vsub.f32 %v2994_v16, %v3152_v31 }
 0x939   :  { %v3158_v21 = vmul.f32 1.442695, %v3156_v32 }
 0x93b   :  { %3761 = vpow2.f32 %v3158_v21 }
 0x941   :  { %v3762_v34 = vpop.eup %3761 }
 0x942   :  { %v3155_v35 = vpop.xlane.xlu2 %3154  ;;  %v3162_v37 = vsel %vm308_vm1, %v3762_v34, 0.0 }
 0x943   :  { %v3157_v38 = vsub.f32 %v3148_v29, %v3155_v35  ;;  %3163 = vadd.xlane.f32.xlu0 %v3162_v37  ;;  %v3559_v29 = vsub.f32 %v3502_v26, %v3524_v27 }
 0x945   :  { %v3160_v39 = vmul.f32 1.442695, %v3157_v38  ;;  %v3560_v30 = vand.u32 4294901760, %v3559_v29 }
 0x947   :  { %3763 = vpow2.f32 %v3160_v39  ;;  %v3561_v31 = vsub.f32 %v3559_v29, %v3560_v30 }
 0x949   :  { %v3562_v32 = vand.u32 4294901760, %v3561_v31 }
 0x94a   :  { %v3199_v40 = vpop.permute.xlu2 %3198 }
 0x94b   :  { %v3219_v33 = vand.u32 4294901760, %v3199_v40 }
 0x94d   :  { %v4125_v36 = vpop.eup %3763  ;;  %v3246_v41 = vsub.f32 %v3199_v40, %v3219_v33  ;;  %3220 = vmatpush.msrb.mxu0 %v3219_v33  ;;  %3296 = vmatpush.msra.mxu3 %v3219_v33 }
 0x94e   :  { %v3165_v55 = vsel %vm308_vm1, %v4125_v36, 0.0 }
 0x94f   :  { %v3247_v42 = vand.u32 4294901760, %v3246_v41  ;;  %3166 = vadd.xlane.f32.xlu1 %v3165_v55  ;;  %3273 = vmatpush.msra.mxu2 %v3246_v41 }
 0x951   :  { %v3248_v43 = vsub.f32 %v3246_v41, %v3247_v42  ;;  %3322 = vmatpush.msra.mxu0 %v3247_v42 }
 0x953   :  { %v3249_v44 = vand.u32 4294901760, %v3248_v43 }
 0x955   :  { %3250 = vmatpush.msrb.mxu1 %v3249_v44 }
 0x957   :  { %3344 = vmatpush.msra.mxu1 %v3219_v33  ;;  %3350 = vrot.lane.b32.xlu0 %v3971_v62, %s3886_s4 }
 0x9b6   :  { %v3164_v45 = vpop.xlane.xlu0 %3163 }
 0x9b7   :  { %3765 = vrcp.f32 %v3164_v45  ;;  %v3179_v51 = vand.u32 2147483648, %v3164_v45  ;;  %v3177_v53 = vand.u32 2147483647, %v3164_v45  ;;  %vm3173_vm13 = vweird.f32 %v3164_v45 }
 0x9b9   :  { %v3180_v57 = vor.u32 1.1754944e-38, %v3179_v51  ;;  %vm3178_vm15 = vcmp.eq.f32.partialorder %v3177_v53, 8.507059e+37 }
 0x9bd   :  { %v3766_v46 = vpop.eup %3765 }
 0x9be   :  { %v3169_v47 = vmul.f32 %v3766_v46, %v3164_v45  ;;  %vm3174_vm12 = vweird.f32 %v3766_v46 }
 0x9bf   :  { %vm3175_vm14 = vmor %vm3173_vm13, %vm3174_vm12 }
 0x9c0   :  { %v3170_v48 = vsub.f32 1.0, %v3169_v47 }
 0x9c2   :  { %v3171_v52 = vmul.f32 %v3766_v46, %v3170_v48  ;;  %v3167_v54 = vpop.xlane.xlu1 %3166 }
 0x9c3   :  { %3767 = vrcp.f32 %v3167_v54  ;;  %v3194_v8 = vand.u32 2147483648, %v3167_v54  ;;  %v3192_v10 = vand.u32 2147483647, %v3167_v54  ;;  %vm3188_vm3 = vweird.f32 %v3167_v54 }
 0x9c4   :  { %v3172_v56 = vadd.f32 %v3766_v46, %v3171_v52 }
 0x9c5   :  { %v3195_v20 = vor.u32 1.1754944e-38, %v3194_v8  ;;  %vm3193_vm5 = vcmp.eq.f32.partialorder %v3192_v10, 8.507059e+37 }
 0x9c6   :  { %v3176_v49 = vsel %vm3175_vm14, %v3766_v46, %v3172_v56 }
 0x9c7   :  { %v3181_v61 = vsel %vm3178_vm15, %v3180_v57, %v3176_v49 }
 0x9c8   :  { %v3182_v50 = vmul.f32 %v3762_v34, %v3181_v61 }
 0x9c9   :  { %v3768_v62 = vpop.eup %3767  ;;  %v3351_v63 = vpop.permute.xlu0 %3350 }
 0x9ca   :  { %v3184_v58 = vmul.f32 %v3768_v62, %v3167_v54  ;;  %v3371_v0 = vand.u32 4294901760, %v3351_v63  ;;  %v3202_v3 = vsel %vm308_vm1, %v3182_v50, 0  ;;  %vm3189_vm2 = vweird.f32 %v3768_v62 }
 0x9cb   :  { %v3221_v6 = vand.u32 4294901760, %v3202_v3  ;;  %vm3190_vm4 = vmor %vm3188_vm3, %vm3189_vm2 }
 0x9cc   :  { %v3185_v7 = vsub.f32 1.0, %v3184_v58  ;;  %v3398_v60 = vsub.f32 %v3351_v63, %v3371_v0  ;;  %3372 = vmatpush.msrb.mxu2 %v3371_v0 }
 0x9cd   :  { %3252 = vmatmul.f32.vlgmr.msrb.gmra.mxu1 %v3221_v6  ;;  %v3222_v9 = vsub.f32 %v3202_v3, %v3221_v6 }
 0x9ce   :  { %v3186_v59 = vmul.f32 %v3768_v62, %v3185_v7  ;;  %v3399_v11 = vand.u32 4294901760, %v3398_v60  ;;  %3448 = vmatpush.msrb.mxu1 %v3371_v0 }
 0x9cf   :  { %3276 = vmatmul.f32.vlgmr.msra.gmra.mxu2 %v3222_v9  ;;  %v3223_v12 = vand.u32 4294901760, %v3222_v9 }
 0x9d0   :  { %v3187_v2 = vadd.f32 %v3768_v62, %v3186_v59  ;;  %v3400_v13 = vsub.f32 %v3398_v60, %v3399_v11  ;;  %3474 = vmatpush.msra.mxu2 %v3399_v11 }
 0x9d1   :  { %3300 = vmatmul.f32.vlgmr.msra.gmra.mxu3 %v3223_v12  ;;  %v3224_v14 = vsub.f32 %v3222_v9, %v3223_v12 }
 0x9d2   :  { %v3191_v15 = vsel %vm3190_vm4, %v3768_v62, %v3187_v2  ;;  %v3401_v1 = vand.u32 4294901760, %v3400_v13 }
 0x9d3   :  { %v3196_v16 = vsel %vm3193_vm5, %v3195_v20, %v3191_v15  ;;  %v3225_v17 = vand.u32 4294901760, %v3224_v14 }
 0x9d4   :  { %v3197_v18 = vmul.f32 %v4125_v36, %v3196_v16  ;;  %3402 = vmatpush.msrb.mxu3 %v3401_v1 }
 0x9d5   :  { %3226 = vmatmul.f32.vlgmr.msrb.gmra.mxu0 %v3225_v17  ;;  %3346 = vmatmul.f32.vlgmr.msra.gmra.mxu1 %v3221_v6 }
 0x9d6   :  { %v3354_v19 = vsel %vm308_vm1, %v3197_v18, 0  ;;  %3425 = vmatpush.msrb.mxu0 %v3398_v60  ;;  %3496 = vmatpush.msra.mxu3 %v3371_v0 }
 0x9d7   :  { %v3373_v22 = vand.u32 4294901760, %v3354_v19  ;;  %3563 = vmatpush.msra.mxu1 %v3562_v32 }
 0x9d9   :  { %3404 = vmatmul.f32.vlgmr.msrb.gmra.mxu3 %v3373_v22  ;;  %v3374_v23 = vsub.f32 %v3354_v19, %v3373_v22 }
 0x9da   :  { %3618 = vmatpush.msrb.mxu3 %v3524_v27 }
 0x9db   :  { %v3375_v24 = vand.u32 4294901760, %v3374_v23 }
 0x9dd   :  { %3324 = vmatmul.f32.vlgmr.msra.gmra.mxu0 %v3221_v6  ;;  %3452 = vmatmul.f32.vlgmr.msrb.gmra.mxu1 %v3375_v24  ;;  %v3376_v25 = vsub.f32 %v3374_v23, %v3375_v24 }
 0x9de   :  { %3525 = vmatpush.msra.mxu0 %v3524_v27  ;;  %3676 = vmatpush.msrb.mxu1 %v3524_v27 }
 0x9df   :  { %v3377_v28 = vand.u32 4294901760, %v3376_v25 }
 0x9e1   :  { %3378 = vmatmul.f32.vlgmr.msrb.gmra.mxu2 %v3377_v28  ;;  %3498 = vmatmul.f32.vlgmr.msra.gmra.mxu3 %v3373_v22 }
 0x9e2   :  { %3590 = vmatpush.msrb.mxu2 %v3559_v29 }
 0x9e5   :  { %3428 = vmatmul.f32.vlgmr.msrb.gmra.mxu0 %v3374_v23 }
 0x9e6   :  { %3650 = vmatpush.msrb.mxu0 %v3560_v30 }
 0x9e9   :  { %3476 = vmatmul.f32.vlgmr.msra.gmra.mxu2 %v3373_v22 }
 0xa4a   :  { %v3253_v21 = vpop.f32.mrf.mxu1 }
 0xa52   :  { %v3227_v34 = vpop.f32.mrf.mxu0  ;;  %v3277_v37 = vpop.f32.mrf.mxu2 }
 0xa53   :  { %v3254_v35 = vadd.f32 %v3253_v21, %v3227_v34  ;;  %v3347_v41 = vpop.f32.mrf.mxu1 }
 0xa54   :  { %v3301_v39 = vpop.f32.mrf.mxu3 }
 0xa55   :  { %v3278_v38 = vadd.f32 %v3277_v37, %v3254_v35 }
 0xa57   :  { %v3302_v40 = vadd.f32 %v3301_v39, %v3278_v38 }
 0xa5a   :  { %v3325_v33 = vpop.f32.mrf.mxu0 }
 0xa5b   :  { %v3326_v36 = vadd.f32 %v3325_v33, %v3302_v40  ;;  %v3453_v56 = vpop.f32.mrf.mxu1 }
 0xa5c   :  { %v3405_v46 = vpop.f32.mrf.mxu3 }
 0xa5d   :  { %v3348_v55 = vadd.f32 %v3347_v41, %v3326_v36 }
 0xa5f   :  { %v3504_v42 = vsel %vm308_vm1, %v3348_v55, 0 }
 0xa60   :  { %v3526_v43 = vand.u32 4294901760, %v3504_v42 }
 0xa62   :  { %v3527_v44 = vsub.f32 %v3504_v42, %v3526_v43  ;;  %3565 = vmatmul.f32.vlgmr.msra.gmra.mxu1 %v3526_v43  ;;  %v3429_v52 = vpop.f32.mrf.mxu0 }
 0xa64   :  { %v3528_v45 = vand.u32 4294901760, %v3527_v44  ;;  %v3379_v47 = vpop.f32.mrf.mxu2  ;;  %3593 = vmatmul.f32.vlgmr.msrb.gmra.mxu2 %v3527_v44  ;;  %v3499_v50 = vpop.f32.mrf.mxu3 }
 0xa65   :  { %v3406_v48 = vadd.f32 %v3405_v46, %v3379_v47 }
 0xa66   :  { %v3529_v51 = vsub.f32 %v3527_v44, %v3528_v45  ;;  %3622 = vmatmul.f32.vlgmr.msrb.gmra.mxu3 %v3528_v45 }
 0xa67   :  { %v3430_v53 = vadd.f32 %v3429_v52, %v3406_v48 }
 0xa68   :  { %v3530_v54 = vand.u32 4294901760, %v3529_v51 }
 0xa69   :  { %v3454_v57 = vadd.f32 %v3453_v56, %v3430_v53 }
 0xa6a   :  { %3531 = vmatmul.f32.vlgmr.msra.gmra.mxu0 %v3530_v54 }
 0xa6c   :  { %v3477_v49 = vpop.f32.mrf.mxu2 }
 0xa6d   :  { %v3478_v61 = vadd.f32 %v3477_v49, %v3454_v57 }
 0xa6f   :  { %v3500_v62 = vadd.f32 %v3499_v50, %v3478_v61 }
 0xa71   :  { %v3507_v63 = vsel %vm308_vm1, %v3500_v62, 0 }
 0xa72   :  { %v3534_v58 = vand.u32 4294901760, %v3507_v63 }
 0xa74   :  { %3569 = vmatmul.f32.gmra.mxu1 %v3534_v58  ;;  %v3535_v0 = vsub.f32 %v3507_v63, %v3534_v58 }
 0xa76   :  { %3598 = vmatmul.f32.gmra.mxu2 %v3535_v0  ;;  %v3536_v3 = vand.u32 4294901760, %v3535_v0 }
 0xa78   :  { %3628 = vmatmul.f32.gmra.mxu3 %v3536_v3  ;;  %v3537_v6 = vsub.f32 %v3535_v0, %v3536_v3 }
 0xa7a   :  { %v3538_v7 = vand.u32 4294901760, %v3537_v6 }
 0xa7c   :  { %3539 = vmatmul.f32.gmra.mxu0 %v3538_v7  ;;  %3678 = vmatmul.f32.vlgmr.msrb.gmra.mxu1 %v3526_v43 }
 0xa84   :  { %3652 = vmatmul.f32.vlgmr.msrb.gmra.mxu0 %v3526_v43  ;;  %3682 = vmatmul.f32.gmra.mxu1 %v3534_v58 }
 0xa8c   :  { %3656 = vmatmul.f32.gmra.mxu0 %v3534_v58 }
 0xadf   :  { %v3566_v60 = vpop.f32.mrf.mxu1 }
 0xae7   :  { %v3532_v8 = vpop.f32.mrf.mxu0  ;;  %v3594_v11 = vpop.f32.mrf.mxu2 }
 0xae8   :  { %v3567_v59 = vadd.f32 %v3566_v60, %v3532_v8 }
 0xae9   :  { %v3623_v2 = vpop.f32.mrf.mxu3 }
 0xaea   :  { %v3595_v12 = vadd.f32 %v3594_v11, %v3567_v59 }
 0xaec   :  { %v3624_v13 = vadd.f32 %v3623_v2, %v3595_v12 }
 0xaf1   :  { %v3570_v9 = vpop.f32.mrf.mxu1 }
 0xaf9   :  { %v3540_v10 = vpop.f32.mrf.mxu0  ;;  %v3679_v14 = vpop.f32.mrf.mxu1 }
 0xafa   :  { %v3571_v20 = vadd.f32 %v3570_v9, %v3540_v10  ;;  %v3599_v16 = vpop.f32.mrf.mxu2 }
 0xafb   :  { %v3629_v22 = vpop.f32.mrf.mxu3 }
 0xafc   :  { %v3600_v17 = vadd.f32 %v3599_v16, %v3571_v20 }
 0xafe   :  { %v3630_v23 = vadd.f32 %v3629_v22, %v3600_v17 }
 0xb01   :  { %v3653_v15 = vpop.f32.mrf.mxu0  ;;  %v3683_v28 = vpop.f32.mrf.mxu1 }
 0xb02   :  { %v3654_v1 = vadd.f32 %v3653_v15, %v3624_v13 }
 0xb04   :  { %v3680_v18 = vadd.f32 %v3679_v14, %v3654_v1 }
 0xb06   :  { %v3686_v19 = vadd.f32 %v3680_v18, %v4116_v4 }
 0xb08   :  { %3688 = vst.msk [vmem:[#allocation8] sm:$0xff] %vm78_vm0, %v3686_v19 }
 0xb09   :  { %v3657_v24 = vpop.f32.mrf.mxu0 }
 0xb0a   :  { %v3658_v25 = vadd.f32 %v3657_v24, %v3630_v23 }
 0xb0c   :  { %v3684_v26 = vadd.f32 %v3683_v28, %v3658_v25 }
 0xb0e   :  { %v3687_v27 = vadd.f32 %v3684_v26, %v4119_v5 }
 0xb10   :  { %3689 = vst.msk [vmem:[#allocation8 + $0x8] sm:$0xff] %vm78_vm0, %v3687_v27 }
 0xb11   :  { %3702 = dma.vmem_to_hbm [thread:$0]  %s3695_s21, 256, %s3697_s24, [#allocation4], %s3872_s26, %s3872_s26, %s3873_s27  }
 0xb12   :  { %3869 = dma.done.wait [#allocation4], 256  }
 0xb13   :  { %3870 = vsyncadd [#allocation4], 4294967040 }
 0xb14   :  { %3707 = vsyncpa [#allocation3], 1 }
 0xb15   :  { %3708 = vsyncpa [#allocation6], 1 }
 0xb16   :  { %3709 = vsyncpa [#allocation4], 1 }

</bundles_post_ra>
